<compile_context>
chip_gen: v5e
topology: v5e:2x2
jax: 0.10.0
libtpu: 0.0.40
codegen_flags: <defaults>
</compile_context>

<pallas_src>
from functools import partial

import jax
import jax.numpy as jnp
from jax.experimental import pallas as pl
from jax.experimental.pallas import tpu as pltpu

# Best rational approximation of ReLU (Boulle et al.), ascending powers.
# P(x) = 1.1915 x^3 + 1.5957 x^2 + 0.5 x + 0.0218 ; Q(x) = 2.383 x^2 + 1.0
_P = (0.0218, 0.5, 1.5957, 1.1915)
_Q0, _Q2 = 1.0, 2.383

LANE = 128  # batch tile (lane dim) is kept a multiple of this


def _rational_ref(x):
    p = ((_P[3] * x + _P[2]) * x + _P[1]) * x + _P[0]
    q = _Q2 * x * x + _Q0
    return p / q


def _rational_kernel(x):
    # Same math; the divide is routed through the EUP reciprocal so it lands
    # on the (otherwise idle) EUP slot instead of the VPU.
    p = ((_P[3] * x + _P[2]) * x + _P[1]) * x + _P[0]
    q = _Q2 * x * x + _Q0
    return p * pl.reciprocal(q, approx=True)


def _mlp_kernel(*refs):
    """refs = (x, w1, b1, w2, b2, ..., wL, bL, out).

    Transposed layout: x is (num_in, tile_n); activations are (features, tile_n);
    output is (num_out, tile_n).  Hidden weights are (out_f, in_f) (PyTorch
    layout) in bf16; first/last-layer weights stay f32 (computed on VPU/XLU).
    """
    x_ref, o_ref = refs[0], refs[-1]
    w_refs = refs[1:-1:2]
    b_refs = refs[2:-1:2]
    n_layers = len(w_refs)

    x = x_ref[...]                      # (num_in, tile_n) f32
    num_in = x.shape[0]

    # ---- Layer 1: num_in broadcast FMAs on the VPU (avoid K=num_in MXU dot).
    w1 = w_refs[0][...]                 # (h1, num_in) f32
    h = w1[:, 0:1] * x[0:1, :]          # (h1, 1) * (1, tile_n) -> (h1, tile_n)
    for k in range(1, num_in):
        h = h + w1[:, k : k + 1] * x[k : k + 1, :]
    h = _rational_kernel(h + b_refs[0][...])

    # ---- Hidden layers 2..L-1: bf16 MXU matmuls, f32 accumulate.
    for li in range(1, n_layers - 1):
        w = w_refs[li][...]             # (out_f, in_f) bf16
        h = jnp.dot(w, h.astype(w.dtype), preferred_element_type=jnp.float32)
        h = _rational_kernel(h + b_refs[li][...])

    # ---- Output layer: per-column mul + sublane reduction (lane-dense, no MXU).
    w_out = w_refs[-1][...]             # (h_last, num_out) f32
    num_out = o_ref.shape[0]
    cols = [
        jnp.sum(w_out[:, j : j + 1] * h, axis=0, keepdims=True)
        for j in range(num_out)
    ]
    out = cols[0] if num_out == 1 else jnp.concatenate(cols, axis=0)
    o_ref[...] = (out + b_refs[-1][...]).astype(o_ref.dtype)   # (num_out, tile_n)


def _round_up(v, m):
    return ((v + m - 1) // m) * m


def _pick_tile(n, tile_n_max):
    """Largest 128-multiple tile <= tile_n_max that still yields >= 2 balanced
    grid steps (when n allows it) so v7x's two TensorCores both get work."""
    tile_n_max = max(LANE, (tile_n_max // LANE) * LANE)
    target = _round_up(-(-n // 2), LANE)       # ceil(n/2), rounded up to 128
    return max(LANE, min(tile_n_max, target))


@partial(jax.jit, static_argnames=("tile_n_max",))
def mlp_forward(x, prepared_params, *, tile_n_max=2048):
    """x: [N, numInputs] float32.  prepared_params: output of prepare_params."""
    n, num_in = x.shape
    num_out = prepared_params[-1][0].shape[1]

    tile_n = _pick_tile(n, tile_n_max)
    n_pad = pl.cdiv(n, tile_n) * tile_n

    # Transposed, batch-padded input: (num_in, n_pad).  Padded columns are zero
    # and their (finite) outputs are discarded below.
    xt = x.T
    if n_pad != n:
        xt = jnp.pad(xt, ((0, 0), (0, n_pad - n)))

    in_specs = [pl.BlockSpec((num_in, tile_n), lambda i: (0, i))]
    flat_args = [xt]
    for w, b in prepared_params:
        in_specs.append(pl.BlockSpec(w.shape, lambda i: (0, 0)))
        in_specs.append(pl.BlockSpec(b.shape, lambda i: (0, 0)))
        flat_args += [w, b]

    out_spec = pl.BlockSpec((num_out, tile_n), lambda i: (0, i))

    out_t = pl.pallas_call(
        _mlp_kernel,
        out_shape=jax.ShapeDtypeStruct((num_out, n_pad), jnp.float32),
        grid_spec=pltpu.PrefetchScalarGridSpec(
            num_scalar_prefetch=0,
            grid=(n_pad // tile_n,),
            in_specs=in_specs,
            out_specs=out_spec,
        ),
        compiler_params=pltpu.CompilerParams(
            dimension_semantics=("parallel",),
        ),
    )(*flat_args)

    return out_t[:, :n].T.reshape(n, num_out)


def init_params(key, num_inputs=2, num_outputs=1, layer_config=(32, 32, 32, 32)):
    """Xavier-normal weights in PyTorch (out_features, in_features) layout and
    zero biases, matching NN.__init__."""
    dims = [num_inputs] + list(layer_config) + [num_outputs]
    params = []
    for fan_in, fan_out in zip(dims[:-1], dims[1:]):
        key, sub = jax.random.split(key)
        std = (2.0 / (fan_in + fan_out)) ** 0.5
        w = std * jax.random.normal(sub, (fan_out, fan_in), dtype=jnp.float32)
        b = jnp.zeros((fan_out,), dtype=jnp.float32)
        params.append((w, b))
    return params


def prepare_params(params, matmul_dtype=jnp.bfloat16):
    """One-time layout conversion for the kernel (hoisted out of the forward):
       * layer 1 weight:   (h1, num_in)     f32   (VPU broadcast-FMA layer)
       * hidden weights:   (out_f, in_f)    bf16  (MXU layers)
       * output weight:    (h_last, num_out) f32  (VPU mul + sublane reduce)
       * all biases:       (out_f, 1)       f32
    """
    n_layers = len(params)
    prepared = []
    for i, (w, b) in enumerate(params):
        if i == 0:
            wk = w.astype(jnp.float32)
        elif i == n_layers - 1:
            wk = w.T.astype(jnp.float32)
        else:
            wk = w.astype(matmul_dtype)
        bk = b.reshape(-1, 1).astype(jnp.float32)
        prepared.append((wk, bk))
    return prepared


def reference_forward(x, params):
    """Pure-JAX f32 reference matching the PyTorch forward."""
    h = x
    for w, b in params[:-1]:
        h = _rational_ref(h @ w.T + b)
    w, b = params[-1]
    return h @ w.T + b


if __name__ == "__main__":
    key = jax.random.PRNGKey(0)
    key, kx = jax.random.split(key)

    # Non-multiple batch exercises the padding path; _pick_tile gives 2 balanced
    # 512-row "parallel" grid steps (both v7x TensorCores get work).
    N, NUM_IN, NUM_OUT = 1000, 2, 1
    x = jax.random.normal(kx, (N, NUM_IN), dtype=jnp.float32)

    params = init_params(key, num_inputs=NUM_IN, num_outputs=NUM_OUT,
                         layer_config=(32, 32, 32, 32))
    prepared = prepare_params(params)          # layout + bf16 cast done once

    out = mlp_forward(x, prepared)
    out = jax.block_until_ready(out)

    ref = reference_forward(x, params)
    assert out.shape == (N, NUM_OUT)
    max_err = float(jnp.max(jnp.abs(out - ref)))
    # Tolerance relaxed vs. the f32 reference because hidden matmuls run in
    # bf16 (f32 accumulation) and the activation divide uses the EUP reciprocal.
    assert jnp.allclose(out, ref, atol=2e-2, rtol=2e-2), f"mismatch, max err {max_err}"

    print("KERNEL_OK")
</pallas_src>

<mosaic_0001>
module attributes {stable_mosaic.version = 11 : i64} {
  func.func @_mlp_kernel(%arg0: i32, %arg1: memref<2x512xf32, #tpu.memory_space<vmem>>, %arg2: memref<32x2xf32, #tpu.memory_space<vmem>>, %arg3: memref<32x1xf32, #tpu.memory_space<vmem>>, %arg4: memref<32x32xbf16, #tpu.memory_space<vmem>>, %arg5: memref<32x1xf32, #tpu.memory_space<vmem>>, %arg6: memref<32x32xbf16, #tpu.memory_space<vmem>>, %arg7: memref<32x1xf32, #tpu.memory_space<vmem>>, %arg8: memref<32x32xbf16, #tpu.memory_space<vmem>>, %arg9: memref<32x1xf32, #tpu.memory_space<vmem>>, %arg10: memref<32x1xf32, #tpu.memory_space<vmem>>, %arg11: memref<1x1xf32, #tpu.memory_space<vmem>>, %arg12: memref<1x512xf32, #tpu.memory_space<vmem>>) attributes {dimension_semantics = [#tpu.dimension_semantics<parallel>], iteration_bounds = array<i64: 2>, scalar_prefetch = 0 : i64, scratch_operands = 0 : i64, tpu.core_type = #tpu.core_type<tc>, window_params = [{transform_indices = @transform_0, window_bounds = array<i64: 2, 512>}, {pipeline_mode = #tpu.pipeline_mode<synchronous>, transform_indices = @transform_1, window_bounds = array<i64: 32, 2>}, {pipeline_mode = #tpu.pipeline_mode<synchronous>, transform_indices = @transform_2, window_bounds = array<i64: 32, 1>}, {pipeline_mode = #tpu.pipeline_mode<synchronous>, transform_indices = @transform_3, window_bounds = array<i64: 32, 32>}, {pipeline_mode = #tpu.pipeline_mode<synchronous>, transform_indices = @transform_4, window_bounds = array<i64: 32, 1>}, {pipeline_mode = #tpu.pipeline_mode<synchronous>, transform_indices = @transform_5, window_bounds = array<i64: 32, 32>}, {pipeline_mode = #tpu.pipeline_mode<synchronous>, transform_indices = @transform_6, window_bounds = array<i64: 32, 1>}, {pipeline_mode = #tpu.pipeline_mode<synchronous>, transform_indices = @transform_7, window_bounds = array<i64: 32, 32>}, {pipeline_mode = #tpu.pipeline_mode<synchronous>, transform_indices = @transform_8, window_bounds = array<i64: 32, 1>}, {pipeline_mode = #tpu.pipeline_mode<synchronous>, transform_indices = @transform_9, window_bounds = array<i64: 32, 1>}, {pipeline_mode = #tpu.pipeline_mode<synchronous>, transform_indices = @transform_10, window_bounds = array<i64: 1, 1>}, {transform_indices = @transform_11, window_bounds = array<i64: 1, 512>}]} {
    %c0 = arith.constant 0 : index
    %c0_0 = arith.constant 0 : index
    %0 = vector.load %arg1[%c0, %c0_0] : memref<2x512xf32, #tpu.memory_space<vmem>>, vector<2x512xf32>
    %c0_1 = arith.constant 0 : index
    %c0_2 = arith.constant 0 : index
    %1 = vector.load %arg2[%c0_1, %c0_2] : memref<32x2xf32, #tpu.memory_space<vmem>>, vector<32x2xf32>
    %2 = vector.extract_strided_slice %1 {offsets = [0, 0], sizes = [32, 1], strides = [1, 1]} : vector<32x2xf32> to vector<32x1xf32>
    %3 = vector.extract_strided_slice %0 {offsets = [0, 0], sizes = [1, 512], strides = [1, 1]} : vector<2x512xf32> to vector<1x512xf32>
    %4 = vector.broadcast %2 : vector<32x1xf32> to vector<32x512xf32>
    %5 = vector.broadcast %3 : vector<1x512xf32> to vector<32x512xf32>
    %6 = arith.mulf %4, %5 : vector<32x512xf32>
    %7 = vector.extract_strided_slice %1 {offsets = [0, 1], sizes = [32, 1], strides = [1, 1]} : vector<32x2xf32> to vector<32x1xf32>
    %8 = vector.extract_strided_slice %0 {offsets = [1, 0], sizes = [1, 512], strides = [1, 1]} : vector<2x512xf32> to vector<1x512xf32>
    %9 = vector.broadcast %7 : vector<32x1xf32> to vector<32x512xf32>
    %10 = vector.broadcast %8 : vector<1x512xf32> to vector<32x512xf32>
    %11 = arith.mulf %9, %10 : vector<32x512xf32>
    %12 = arith.addf %6, %11 : vector<32x512xf32>
    %c0_3 = arith.constant 0 : index
    %c0_4 = arith.constant 0 : index
    %13 = vector.load %arg3[%c0_3, %c0_4] : memref<32x1xf32, #tpu.memory_space<vmem>>, vector<32x1xf32>
    %14 = vector.broadcast %13 : vector<32x1xf32> to vector<32x512xf32>
    %15 = arith.addf %12, %14 : vector<32x512xf32>
    %cst = arith.constant 1.191500e+00 : f32
    %16 = vector.broadcast %cst : f32 to vector<32x512xf32>
    %17 = arith.mulf %16, %15 : vector<32x512xf32>
    %cst_5 = arith.constant 1.595700e+00 : f32
    %18 = vector.broadcast %cst_5 : f32 to vector<32x512xf32>
    %19 = arith.addf %17, %18 : vector<32x512xf32>
    %20 = arith.mulf %19, %15 : vector<32x512xf32>
    %cst_6 = arith.constant 5.000000e-01 : f32
    %21 = vector.broadcast %cst_6 : f32 to vector<32x512xf32>
    %22 = arith.addf %20, %21 : vector<32x512xf32>
    %23 = arith.mulf %22, %15 : vector<32x512xf32>
    %cst_7 = arith.constant 2.180000e-02 : f32
    %24 = vector.broadcast %cst_7 : f32 to vector<32x512xf32>
    %25 = arith.addf %23, %24 : vector<32x512xf32>
    %cst_8 = arith.constant 2.383000e+00 : f32
    %26 = vector.broadcast %cst_8 : f32 to vector<32x512xf32>
    %27 = arith.mulf %26, %15 : vector<32x512xf32>
    %28 = arith.mulf %27, %15 : vector<32x512xf32>
    %cst_9 = arith.constant 1.000000e+00 : f32
    %29 = vector.broadcast %cst_9 : f32 to vector<32x512xf32>
    %30 = arith.addf %28, %29 : vector<32x512xf32>
    %31 = tpu.reciprocal %30 {approx = true} : vector<32x512xf32> -> vector<32x512xf32>
    %32 = arith.mulf %25, %31 : vector<32x512xf32>
    %c0_10 = arith.constant 0 : index
    %c0_11 = arith.constant 0 : index
    %33 = vector.load %arg4[%c0_10, %c0_11] : memref<32x32xbf16, #tpu.memory_space<vmem>>, vector<32x32xbf16>
    %34 = arith.truncf %32 : vector<32x512xf32> to vector<32x512xbf16>
    %cst_12 = arith.constant dense<0.000000e+00> : vector<32x512xf32>
    %35 = tpu.matmul %33, %34, %cst_12 {dimension_numbers = #tpu.dot_dimension_numbers<[1], [0], [0], [1], [0, 0, 1, 1], [], []>} : vector<32x32xbf16>, vector<32x512xbf16>, vector<32x512xf32> -> vector<32x512xf32>
    %c0_13 = arith.constant 0 : index
    %c0_14 = arith.constant 0 : index
    %36 = vector.load %arg5[%c0_13, %c0_14] : memref<32x1xf32, #tpu.memory_space<vmem>>, vector<32x1xf32>
    %37 = vector.broadcast %36 : vector<32x1xf32> to vector<32x512xf32>
    %38 = arith.addf %35, %37 : vector<32x512xf32>
    %cst_15 = arith.constant 1.191500e+00 : f32
    %39 = vector.broadcast %cst_15 : f32 to vector<32x512xf32>
    %40 = arith.mulf %39, %38 : vector<32x512xf32>
    %cst_16 = arith.constant 1.595700e+00 : f32
    %41 = vector.broadcast %cst_16 : f32 to vector<32x512xf32>
    %42 = arith.addf %40, %41 : vector<32x512xf32>
    %43 = arith.mulf %42, %38 : vector<32x512xf32>
    %cst_17 = arith.constant 5.000000e-01 : f32
    %44 = vector.broadcast %cst_17 : f32 to vector<32x512xf32>
    %45 = arith.addf %43, %44 : vector<32x512xf32>
    %46 = arith.mulf %45, %38 : vector<32x512xf32>
    %cst_18 = arith.constant 2.180000e-02 : f32
    %47 = vector.broadcast %cst_18 : f32 to vector<32x512xf32>
    %48 = arith.addf %46, %47 : vector<32x512xf32>
    %cst_19 = arith.constant 2.383000e+00 : f32
    %49 = vector.broadcast %cst_19 : f32 to vector<32x512xf32>
    %50 = arith.mulf %49, %38 : vector<32x512xf32>
    %51 = arith.mulf %50, %38 : vector<32x512xf32>
    %cst_20 = arith.constant 1.000000e+00 : f32
    %52 = vector.broadcast %cst_20 : f32 to vector<32x512xf32>
    %53 = arith.addf %51, %52 : vector<32x512xf32>
    %54 = tpu.reciprocal %53 {approx = true} : vector<32x512xf32> -> vector<32x512xf32>
    %55 = arith.mulf %48, %54 : vector<32x512xf32>
    %c0_21 = arith.constant 0 : index
    %c0_22 = arith.constant 0 : index
    %56 = vector.load %arg6[%c0_21, %c0_22] : memref<32x32xbf16, #tpu.memory_space<vmem>>, vector<32x32xbf16>
    %57 = arith.truncf %55 : vector<32x512xf32> to vector<32x512xbf16>
    %cst_23 = arith.constant dense<0.000000e+00> : vector<32x512xf32>
    %58 = tpu.matmul %56, %57, %cst_23 {dimension_numbers = #tpu.dot_dimension_numbers<[1], [0], [0], [1], [0, 0, 1, 1], [], []>} : vector<32x32xbf16>, vector<32x512xbf16>, vector<32x512xf32> -> vector<32x512xf32>
    %c0_24 = arith.constant 0 : index
    %c0_25 = arith.constant 0 : index
    %59 = vector.load %arg7[%c0_24, %c0_25] : memref<32x1xf32, #tpu.memory_space<vmem>>, vector<32x1xf32>
    %60 = vector.broadcast %59 : vector<32x1xf32> to vector<32x512xf32>
    %61 = arith.addf %58, %60 : vector<32x512xf32>
    %cst_26 = arith.constant 1.191500e+00 : f32
    %62 = vector.broadcast %cst_26 : f32 to vector<32x512xf32>
    %63 = arith.mulf %62, %61 : vector<32x512xf32>
    %cst_27 = arith.constant 1.595700e+00 : f32
    %64 = vector.broadcast %cst_27 : f32 to vector<32x512xf32>
    %65 = arith.addf %63, %64 : vector<32x512xf32>
    %66 = arith.mulf %65, %61 : vector<32x512xf32>
    %cst_28 = arith.constant 5.000000e-01 : f32
    %67 = vector.broadcast %cst_28 : f32 to vector<32x512xf32>
    %68 = arith.addf %66, %67 : vector<32x512xf32>
    %69 = arith.mulf %68, %61 : vector<32x512xf32>
    %cst_29 = arith.constant 2.180000e-02 : f32
    %70 = vector.broadcast %cst_29 : f32 to vector<32x512xf32>
    %71 = arith.addf %69, %70 : vector<32x512xf32>
    %cst_30 = arith.constant 2.383000e+00 : f32
    %72 = vector.broadcast %cst_30 : f32 to vector<32x512xf32>
    %73 = arith.mulf %72, %61 : vector<32x512xf32>
    %74 = arith.mulf %73, %61 : vector<32x512xf32>
    %cst_31 = arith.constant 1.000000e+00 : f32
    %75 = vector.broadcast %cst_31 : f32 to vector<32x512xf32>
    %76 = arith.addf %74, %75 : vector<32x512xf32>
    %77 = tpu.reciprocal %76 {approx = true} : vector<32x512xf32> -> vector<32x512xf32>
    %78 = arith.mulf %71, %77 : vector<32x512xf32>
    %c0_32 = arith.constant 0 : index
    %c0_33 = arith.constant 0 : index
    %79 = vector.load %arg8[%c0_32, %c0_33] : memref<32x32xbf16, #tpu.memory_space<vmem>>, vector<32x32xbf16>
    %80 = arith.truncf %78 : vector<32x512xf32> to vector<32x512xbf16>
    %cst_34 = arith.constant dense<0.000000e+00> : vector<32x512xf32>
    %81 = tpu.matmul %79, %80, %cst_34 {dimension_numbers = #tpu.dot_dimension_numbers<[1], [0], [0], [1], [0, 0, 1, 1], [], []>} : vector<32x32xbf16>, vector<32x512xbf16>, vector<32x512xf32> -> vector<32x512xf32>
    %c0_35 = arith.constant 0 : index
    %c0_36 = arith.constant 0 : index
    %82 = vector.load %arg9[%c0_35, %c0_36] : memref<32x1xf32, #tpu.memory_space<vmem>>, vector<32x1xf32>
    %83 = vector.broadcast %82 : vector<32x1xf32> to vector<32x512xf32>
    %84 = arith.addf %81, %83 : vector<32x512xf32>
    %cst_37 = arith.constant 1.191500e+00 : f32
    %85 = vector.broadcast %cst_37 : f32 to vector<32x512xf32>
    %86 = arith.mulf %85, %84 : vector<32x512xf32>
    %cst_38 = arith.constant 1.595700e+00 : f32
    %87 = vector.broadcast %cst_38 : f32 to vector<32x512xf32>
    %88 = arith.addf %86, %87 : vector<32x512xf32>
    %89 = arith.mulf %88, %84 : vector<32x512xf32>
    %cst_39 = arith.constant 5.000000e-01 : f32
    %90 = vector.broadcast %cst_39 : f32 to vector<32x512xf32>
    %91 = arith.addf %89, %90 : vector<32x512xf32>
    %92 = arith.mulf %91, %84 : vector<32x512xf32>
    %cst_40 = arith.constant 2.180000e-02 : f32
    %93 = vector.broadcast %cst_40 : f32 to vector<32x512xf32>
    %94 = arith.addf %92, %93 : vector<32x512xf32>
    %cst_41 = arith.constant 2.383000e+00 : f32
    %95 = vector.broadcast %cst_41 : f32 to vector<32x512xf32>
    %96 = arith.mulf %95, %84 : vector<32x512xf32>
    %97 = arith.mulf %96, %84 : vector<32x512xf32>
    %cst_42 = arith.constant 1.000000e+00 : f32
    %98 = vector.broadcast %cst_42 : f32 to vector<32x512xf32>
    %99 = arith.addf %97, %98 : vector<32x512xf32>
    %100 = tpu.reciprocal %99 {approx = true} : vector<32x512xf32> -> vector<32x512xf32>
    %101 = arith.mulf %94, %100 : vector<32x512xf32>
    %c0_43 = arith.constant 0 : index
    %c0_44 = arith.constant 0 : index
    %102 = vector.load %arg10[%c0_43, %c0_44] : memref<32x1xf32, #tpu.memory_space<vmem>>, vector<32x1xf32>
    %103 = vector.broadcast %102 : vector<32x1xf32> to vector<32x512xf32>
    %104 = arith.mulf %103, %101 : vector<32x512xf32>
    %cst_45 = arith.constant dense<0.000000e+00> : vector<512xf32>
    %105 = vector.multi_reduction <add>, %104, %cst_45 [0] : vector<32x512xf32> to vector<512xf32>
    %106 = vector.shape_cast %105 : vector<512xf32> to vector<1x512xf32>
    %c0_46 = arith.constant 0 : index
    %c0_47 = arith.constant 0 : index
    %107 = vector.load %arg11[%c0_46, %c0_47] : memref<1x1xf32, #tpu.memory_space<vmem>>, vector<1x1xf32>
    %108 = vector.broadcast %107 : vector<1x1xf32> to vector<1x512xf32>
    %109 = arith.addf %106, %108 : vector<1x512xf32>
    %c0_48 = arith.constant 0 : index
    %c0_49 = arith.constant 0 : index
    %110 = vector.load %arg12[%c0_48, %c0_49] : memref<1x512xf32, #tpu.memory_space<vmem>>, vector<1x512xf32>
    tpu.vector_store %arg12[%c0_48, %c0_49], %109 {strides = array<i32>} : memref<1x512xf32, #tpu.memory_space<vmem>>, vector<1x512xf32>,
    return
  }
  func.func @transform_0(%arg0: i32) -> (i32, i32) {
    %c0_i32 = arith.constant 0 : i32
    %c0_i32_0 = arith.constant 0 : i32
    return %c0_i32, %arg0 : i32, i32
  }
  func.func @transform_1(%arg0: i32) -> (i32, i32) {
    %c0_i32 = arith.constant 0 : i32
    %c0_i32_0 = arith.constant 0 : i32
    %c0_i32_1 = arith.constant 0 : i32
    return %c0_i32, %c0_i32_0 : i32, i32
  }
  func.func @transform_2(%arg0: i32) -> (i32, i32) {
    %c0_i32 = arith.constant 0 : i32
    %c0_i32_0 = arith.constant 0 : i32
    %c0_i32_1 = arith.constant 0 : i32
    return %c0_i32, %c0_i32_0 : i32, i32
  }
  func.func @transform_3(%arg0: i32) -> (i32, i32) {
    %c0_i32 = arith.constant 0 : i32
    %c0_i32_0 = arith.constant 0 : i32
    %c0_i32_1 = arith.constant 0 : i32
    return %c0_i32, %c0_i32_0 : i32, i32
  }
  func.func @transform_4(%arg0: i32) -> (i32, i32) {
    %c0_i32 = arith.constant 0 : i32
    %c0_i32_0 = arith.constant 0 : i32
    %c0_i32_1 = arith.constant 0 : i32
    return %c0_i32, %c0_i32_0 : i32, i32
  }
  func.func @transform_5(%arg0: i32) -> (i32, i32) {
    %c0_i32 = arith.constant 0 : i32
    %c0_i32_0 = arith.constant 0 : i32
    %c0_i32_1 = arith.constant 0 : i32
    return %c0_i32, %c0_i32_0 : i32, i32
  }
  func.func @transform_6(%arg0: i32) -> (i32, i32) {
    %c0_i32 = arith.constant 0 : i32
    %c0_i32_0 = arith.constant 0 : i32
    %c0_i32_1 = arith.constant 0 : i32
    return %c0_i32, %c0_i32_0 : i32, i32
  }
  func.func @transform_7(%arg0: i32) -> (i32, i32) {
    %c0_i32 = arith.constant 0 : i32
    %c0_i32_0 = arith.constant 0 : i32
    %c0_i32_1 = arith.constant 0 : i32
    return %c0_i32, %c0_i32_0 : i32, i32
  }
  func.func @transform_8(%arg0: i32) -> (i32, i32) {
    %c0_i32 = arith.constant 0 : i32
    %c0_i32_0 = arith.constant 0 : i32
    %c0_i32_1 = arith.constant 0 : i32
    return %c0_i32, %c0_i32_0 : i32, i32
  }
  func.func @transform_9(%arg0: i32) -> (i32, i32) {
    %c0_i32 = arith.constant 0 : i32
    %c0_i32_0 = arith.constant 0 : i32
    %c0_i32_1 = arith.constant 0 : i32
    return %c0_i32, %c0_i32_0 : i32, i32
  }
  func.func @transform_10(%arg0: i32) -> (i32, i32) {
    %c0_i32 = arith.constant 0 : i32
    %c0_i32_0 = arith.constant 0 : i32
    %c0_i32_1 = arith.constant 0 : i32
    return %c0_i32, %c0_i32_0 : i32, i32
  }
  func.func @transform_11(%arg0: i32) -> (i32, i32) {
    %c0_i32 = arith.constant 0 : i32
    %c0_i32_0 = arith.constant 0 : i32
    return %c0_i32, %arg0 : i32, i32
  }
}

</mosaic_0001>

<bundles_post_ra>
// kernel: mlp_forward.1
= control target key start
LH: loop header
LB: loop body
LE: loop exit
PB: predicated region body
PF: predicated region fallthrough
CT: control target
= control target key end

     0   :  { %s2070_s19 = smov 0   ;;  %s2658_s0 = inlined_call_operand.vmem [shape: f32[2,1024], index: 0, kind: input, shape index: {}]   ;;  %s2659_s1 = inlined_call_operand.vmem [shape: f32[32,2], index: 1, kind: input, shape index: {}]   ;;  %s2660_s2 = inlined_call_operand.vmem [shape: f32[32,1], index: 2, kind: input, shape index: {}]   ;;  %s2661_s3 = inlined_call_operand.vmem [shape: bf16[32,32], index: 3, kind: input, shape index: {}]   ;;  %s2662_s4 = inlined_call_operand.vmem [shape: f32[32,1], index: 4, kind: input, shape index: {}]   ;;  %s2663_s5 = inlined_call_operand.vmem [shape: bf16[32,32], index: 5, kind: input, shape index: {}]   ;;  %s2664_s6 = inlined_call_operand.vmem [shape: f32[32,1], index: 6, kind: input, shape index: {}]   ;;  %s2665_s7 = inlined_call_operand.vmem [shape: bf16[32,32], index: 7, kind: input, shape index: {}]   ;;  %s2666_s8 = inlined_call_operand.vmem [shape: f32[32,1], index: 8, kind: input, shape index: {}]   ;;  %s2667_s9 = inlined_call_operand.vmem [shape: f32[32,1], index: 9, kind: input, shape index: {}]   ;;  %s2668_s10 = inlined_call_operand.<no memory space> [shape: f32[1,1], index: 10, kind: input, shape index: {}]   ;;  %s2669_s11 = inlined_call_operand.vmem [shape: f32[1,1024], index: 11, kind: output, shape index: {}]  }
   0x1   :  { %v16_v0 = vstv %s2668_s10 }
   0x2   :  { %17 = vst [vmem:[#allocation2] sm:$0x1] %v16_v0 }
   0x3 LB: > { %s1790_s20 = sadd.s32 4294967295, %s2003_s19   ;;  %p1794_p0 = scmp.ge.s32.totalorder %s2003_s19, 1  ;;  %s2003_s19 = sphi %s2070_s19, %s23_s19  }
   0x4   : > { %p340_p1 = scmp.lt.s32.totalorder %s2003_s19, 3 }
   0x6   : > { %p341_p2 = pnand %p1794_p0, %p340_p1 }
   0x7   : > { %s1795_s13 = sshll.u32 (!%p341_p2), %s1790_s20, 2 }
   0x8   : > { %344 = sbr.rel (%p341_p2) target bundleno = 767 (0x2ff), region = 64  ;;  %p380_p3 = scmp.lt.s32.totalorder (!%p341_p2), %s1795_s13, 7 }
   0xd   : > { %v394_v1 = vld [vmem:[%s2659_s1 + $0x10] sm:$0xff]  ;;  %v392_v2 = vld [vmem:[%s2659_s1] sm:$0xff]  ;;  %v2005_v3 = vmov 1   ;;  %v2006_v4 = vmov 0   ;;  %v395_v5 = vld [vmem:[%s2659_s1 + $0x18] sm:$0xff]  ;;  %s2671_s13 = smov (!%p380_p3, %s1795_s13), 7 }
   0xe   : > { %1866 = vset.pattern.permute.xlu0 %v2005_v3  ;;  %1864 = vset.pattern.permute.xlu1 %v2005_v3  ;;  %v393_v6 = vld [vmem:[%s2659_s1 + $0x8] sm:$0xff]  ;;  %v507_v7 = vld [vmem:[%s2660_s2 + $0x10] sm:$0xff]  ;;  %v505_v8 = vld [vmem:[%s2660_s2] sm:$0xff]  ;;  %s1796_s14 = sshll.u32 %s2671_s13, 1  ;;  %vm767_vm0 = vcmask 261120   ;;  %vm1728_vm1 = vcmask 1040384  }
   0xf   : > { %1865 = vset.pattern.permute.xlu2 %v2006_v4  ;;  %454 = vperm.xlu1 %1864, %v394_v1   ;;  %v508_v9 = vld [vmem:[%s2660_s2 + $0x18] sm:$0xff]  ;;  %v506_v10 = vld [vmem:[%s2660_s2 + $0x8] sm:$0xff]  ;;  %v735_v12 = vld [vmem:[%s2662_s4 + $0x10] sm:$0xff]  ;;  %s383_s17 = scalar_lea.vmem %s2658_s0, %s1796_s14  ;;  %vm1730_vm2 = vcmask 1042434   ;;  %vm1732_vm3 = vcmask 1041408   ;;  %s388_s14 = scalar_lea.vmem %s2669_s11, %s2671_s13 }
  0x10   : > { %446 = vperm.xlu0 %1866, %v392_v2   ;;  %398 = vperm.xlu2 %1865, %v392_v2   ;;  %v736_v11 = vld [vmem:[%s2662_s4 + $0x18] sm:$0xff]  ;;  %v1040_v13 = vld [vmem:[%s2664_s6 + $0x10] sm:$0xff]  ;;  %v734_v14 = vld [vmem:[%s2662_s4 + $0x8] sm:$0xff] }
  0x11   : > { %v733_v15 = vld [vmem:[%s2662_s4] sm:$0xff]  ;;  %v1039_v16 = vld [vmem:[%s2664_s6 + $0x8] sm:$0xff]  ;;  %v1041_v18 = vld [vmem:[%s2664_s6 + $0x18] sm:$0xff] }
  0x12   : > { %v1038_v17 = vld [vmem:[%s2664_s6] sm:$0xff]  ;;  %v1344_v19 = vld [vmem:[%s2666_s8 + $0x10] sm:$0xff]  ;;  %v1343_v20 = vld [vmem:[%s2666_s8 + $0x8] sm:$0xff] }
  0x13   : > { %v1342_v21 = vld [vmem:[%s2666_s8] sm:$0xff]  ;;  %v1635_v22 = vld [vmem:[%s2667_s9 + $0x8] sm:$0xff]  ;;  %v1345_v24 = vld [vmem:[%s2666_s8 + $0x18] sm:$0xff] }
  0x14   : > { %v1634_v23 = vld [vmem:[%s2667_s9] sm:$0xff]  ;;  %v1637_v26 = vld [vmem:[%s2667_s9 + $0x18] sm:$0xff]  ;;  %v1636_v27 = vld [vmem:[%s2667_s9 + $0x10] sm:$0xff] }
  0x15   : > { %v1710_v25 = vld [vmem:[#allocation2] sm:$0x1] }
  0x16   : > { %v391_v30 = vld [vmem:[%s383_s17] sm:$0xff] }
  0x17   : > { %458 = vperm.xlu1 %1864, %v395_v5   ;;  %v417_v31 = vperm.slane %v391_v30, 0  ;;  %v418_v32 = vperm.slane %v391_v30, 2  ;;  %v461_v33 = vperm.slane %v391_v30, 1  ;;  %v462_v34 = vperm.slane %v391_v30, 3 }
  0x18   : > { %1867 = vset.pattern.permute.xlu0 %v2006_v4  ;;  %403 = vperm.xlu2 %1865, %v393_v6   ;;  %v419_v38 = vperm.slane %v391_v30, 4  ;;  %v420_v39 = vperm.slane %v391_v30, 6  ;;  %v463_v40 = vperm.slane %v391_v30, 5  ;;  %v464_v41 = vperm.slane %v391_v30, 7 }
  0x19   : > { %408 = vperm.xlu0 %1867, %v394_v1   ;;  %v2160_v36 = vperm.slane %v417_v31, 0  ;;  %v2162_v37 = vperm.slane %v418_v32, 0  ;;  %v2164_v42 = vperm.slane %v461_v33, 1  ;;  %v2166_v43 = vperm.slane %v462_v34, 1 }
  0x1a   : > { %v2170_v47 = vperm.slane %v419_v38, 0  ;;  %v2172_v48 = vperm.slane %v420_v39, 0  ;;  %v471_v49 = vperm.slane %v463_v40, 1  ;;  %v2174_v50 = vperm.slane %v464_v41, 1 }
  0x1f   : > { %450 = vperm.xlu1 %1864, %v393_v6  }
  0x20   : > { %521 = vperm.xlu2 %1865, %v507_v7  }
  0x21   : > { %413 = vperm.xlu0 %1867, %v395_v5  }
  0x27   : > { %1868 = vset.pattern.permute.xlu1 %v2006_v4 }
  0x28   : > { %511 = vperm.xlu2 %1865, %v505_v8   ;;  %526 = vperm.xlu1 %1868, %v508_v9  }
  0x29   : > { %516 = vperm.xlu0 %1867, %v506_v10  }
  0x30   : > { %754 = vperm.xlu2 %1865, %v736_v11   ;;  %749 = vperm.xlu1 %1868, %v735_v12  }
  0x31   : > { %1054 = vperm.xlu0 %1867, %v1040_v13  }
  0x38   : > { %744 = vperm.xlu2 %1865, %v734_v14   ;;  %739 = vperm.xlu1 %1868, %v733_v15  }
  0x39   : > { %1049 = vperm.xlu0 %1867, %v1039_v16  }
  0x40   : > { %1044 = vperm.xlu2 %1865, %v1038_v17   ;;  %1059 = vperm.xlu1 %1868, %v1041_v18  }
  0x41   : > { %1358 = vperm.xlu0 %1867, %v1344_v19  }
  0x48   : > { %1353 = vperm.xlu2 %1865, %v1343_v20   ;;  %1348 = vperm.xlu1 %1868, %v1342_v21  }
  0x49   : > { %1645 = vperm.xlu0 %1867, %v1635_v22  }
  0x50   : > { %1640 = vperm.xlu2 %1865, %v1634_v23   ;;  %1363 = vperm.xlu1 %1868, %v1345_v24  }
  0x51   : > { %1713 = vperm.xlu0 %1867, %v1710_v25  }
  0x58   : > { %1655 = vperm.xlu2 %1865, %v1637_v26   ;;  %1650 = vperm.xlu1 %1868, %v1636_v27  }
  0x6a   : > { %v399_v28 = vpop.permute.xlu2 %398 }
  0x6b   : > { %v429_v44 = vmul.f32 %v2160_v36, %v399_v28  ;;  %v430_v45 = vmul.f32 %v2162_v37, %v399_v28  ;;  %v431_v56 = vmul.f32 %v2170_v47, %v399_v28  ;;  %v432_v57 = vmul.f32 %v2172_v48, %v399_v28 }
  0x72   : > { %v404_v29 = vpop.permute.xlu2 %403 }
  0x73   : > { %v2182_v61 = vmul.f32 %v2160_v36, %v404_v29  ;;  %v434_v0 = vmul.f32 %v2162_v37, %v404_v29  ;;  %v435_v1 = vmul.f32 %v2170_v47, %v404_v29  ;;  %v2187_v2 = vmul.f32 %v2172_v48, %v404_v29 }
  0x7a   : > { %v2158_v35 = vpop.permute.xlu2 %521 }
  0x81   : > { %v455_v46 = vpop.permute.xlu1 %454 }
  0x82   : > { %v447_v51 = vpop.permute.xlu0 %446  ;;  %v512_v60 = vpop.permute.xlu2 %511  ;;  %v481_v3 = vmul.f32 %v2164_v42, %v455_v46  ;;  %v482_v4 = vmul.f32 %v2166_v43, %v455_v46  ;;  %v483_v9 = vmul.f32 %v471_v49, %v455_v46  ;;  %v484_v10 = vmul.f32 %v2174_v50, %v455_v46 }
  0x83   : > { %v473_v52 = vmul.f32 %v2164_v42, %v447_v51  ;;  %v474_v53 = vmul.f32 %v2166_v43, %v447_v51  ;;  %v475_v58 = vmul.f32 %v471_v49, %v447_v51  ;;  %v476_v59 = vmul.f32 %v2174_v50, %v447_v51 }
  0x85   : > { %v489_v54 = vadd.f32 %v473_v52, %v429_v44  ;;  %v490_v55 = vadd.f32 %v474_v53, %v430_v45  ;;  %v491_v11 = vadd.f32 %v475_v58, %v431_v56  ;;  %v492_v12 = vadd.f32 %v476_v59, %v432_v57 }
  0x87   : > { %v529_v62 = vadd.f32 %v512_v60, %v489_v54  ;;  %v530_v63 = vadd.f32 %v512_v60, %v490_v55  ;;  %v2196_v26 = vadd.f32 %v512_v60, %v491_v11  ;;  %v2198_v30 = vadd.f32 %v512_v60, %v492_v12 }
  0x89   : > { %v459_v5 = vpop.permute.xlu1 %458  ;;  %v545_v6 = vmul.f32 1.1915, %v529_v62  ;;  %v641_v7 = vmul.f32 2.383, %v529_v62  ;;  %v546_v8 = vmul.f32 1.1915, %v530_v63 }
  0x8a   : > { %v642_v17 = vmul.f32 2.383, %v530_v63  ;;  %v485_v31 = vmul.f32 %v2164_v42, %v459_v5  ;;  %v486_v41 = vmul.f32 %v2166_v43, %v459_v5  ;;  %v487_v44 = vmul.f32 %v471_v49, %v459_v5 }
  0x8b   : > { %v409_v13 = vpop.permute.xlu0 %408  ;;  %v561_v14 = vadd.f32 1.5957, %v545_v6  ;;  %v657_v15 = vmul.f32 %v641_v7, %v529_v62  ;;  %v562_v16 = vadd.f32 1.5957, %v546_v8  ;;  %v488_v45 = vmul.f32 %v2174_v50, %v459_v5 }
  0x8c   : > { %v437_v18 = vmul.f32 %v2160_v36, %v409_v13  ;;  %v438_v19 = vmul.f32 %v2162_v37, %v409_v13  ;;  %v439_v20 = vmul.f32 %v2170_v47, %v409_v13  ;;  %v440_v21 = vmul.f32 %v2172_v48, %v409_v13 }
  0x8d   : > { %v577_v22 = vmul.f32 %v561_v14, %v529_v62  ;;  %v673_v23 = vadd.f32 1.0, %v657_v15  ;;  %v578_v24 = vmul.f32 %v562_v16, %v530_v63  ;;  %v658_v25 = vmul.f32 %v642_v17, %v530_v63 }
  0x8e   : > { %v497_v27 = vadd.f32 %v481_v3, %v437_v18  ;;  %v498_v28 = vadd.f32 %v482_v4, %v438_v19  ;;  %v499_v29 = vadd.f32 %v483_v9, %v439_v20  ;;  %v500_v32 = vadd.f32 %v484_v10, %v440_v21 }
  0x8f   : > { %v593_v33 = vadd.f32 0.5, %v577_v22  ;;  %v594_v39 = vadd.f32 0.5, %v578_v24  ;;  %v674_v40 = vadd.f32 1.0, %v658_v25  ;;  %1869 = vrcp.f32 %v673_v23 }
  0x90   : > { %v2202_v34 = vadd.f32 %v2158_v35, %v497_v27  ;;  %v2205_v38 = vadd.f32 %v2158_v35, %v498_v28  ;;  %v2210_v51 = vadd.f32 %v2158_v35, %v499_v29  ;;  %v2215_v55 = vadd.f32 %v2158_v35, %v500_v32 }
  0x91   : > { %v451_v46 = vpop.permute.xlu1 %450  ;;  %v2221_v3 = vmul.f32 %v593_v33, %v529_v62  ;;  %v2223_v4 = vmul.f32 %v594_v39, %v530_v63  ;;  %1871 = vrcp.f32 %v674_v40 }
  0x92   : > { %v477_v52 = vmul.f32 %v2164_v42, %v451_v46  ;;  %v478_v53 = vmul.f32 %v2166_v43, %v451_v46  ;;  %v479_v54 = vmul.f32 %v471_v49, %v451_v46  ;;  %v553_v57 = vmul.f32 1.1915, %v2202_v34 }
  0x93   : > { %v414_v56 = vpop.permute.xlu0 %413  ;;  %v649_v58 = vmul.f32 2.383, %v2202_v34  ;;  %v554_v59 = vmul.f32 1.1915, %v2205_v38  ;;  %v2226_v42 = vmul.f32 %v2174_v50, %v451_v46  ;;  %v2231_v49 = vmul.f32 1.1915, %v2196_v26 }
  0x94   : > { %v441_v60 = vmul.f32 %v2160_v36, %v414_v56  ;;  %v442_v35 = vmul.f32 %v2162_v37, %v414_v56  ;;  %v443_v43 = vmul.f32 %v2170_v47, %v414_v56  ;;  %v444_v5 = vmul.f32 %v2172_v48, %v414_v56 }
  0x95   : > { %v493_v6 = vadd.f32 %v477_v52, %v2182_v61  ;;  %v494_v36 = vadd.f32 %v478_v53, %v434_v0  ;;  %v2235_v62 = vadd.f32 %v479_v54, %v435_v1  ;;  %v2237_v63 = vpop.eup %1869  ;;  %v569_v7 = vadd.f32 1.5957, %v553_v57 }
  0x96   : > { %v665_v50 = vmul.f32 %v649_v58, %v2202_v34  ;;  %v570_v8 = vadd.f32 1.5957, %v554_v59  ;;  %v650_v37 = vmul.f32 2.383, %v2205_v38  ;;  %v501_v9 = vadd.f32 %v485_v31, %v441_v60 }
  0x97   : > { %v555_v47 = vmul.f32 1.1915, %v2210_v51  ;;  %v651_v10 = vmul.f32 2.383, %v2210_v51  ;;  %v556_v48 = vmul.f32 1.1915, %v2215_v55  ;;  %v502_v11 = vadd.f32 %v486_v41, %v442_v35  ;;  %v2245_v12 = vpop.eup %1871 }
  0x98   : > { %v503_v61 = vadd.f32 %v487_v44, %v443_v43  ;;  %v585_v0 = vmul.f32 %v569_v7, %v2202_v34  ;;  %v681_v1 = vadd.f32 1.0, %v665_v50  ;;  %v504_v14 = vadd.f32 %v488_v45, %v444_v5 }
  0x99   : > { %v586_v15 = vmul.f32 %v570_v8, %v2205_v38  ;;  %v666_v16 = vmul.f32 %v650_v37, %v2205_v38  ;;  %v571_v17 = vadd.f32 1.5957, %v555_v47  ;;  %v667_v22 = vmul.f32 %v651_v10, %v2210_v51 }
  0x9a   : > { %v527_v13 = vpop.permute.xlu1 %526  ;;  %v572_v25 = vadd.f32 1.5957, %v556_v48  ;;  %v652_v27 = vmul.f32 2.383, %v2215_v55  ;;  %v601_v29 = vadd.f32 0.5, %v585_v0  ;;  %1873 = vrcp.f32 %v681_v1 }
  0x9b   : > { %v541_v18 = vadd.f32 %v527_v13, %v501_v9  ;;  %v542_v19 = vadd.f32 %v527_v13, %v502_v11  ;;  %v543_v20 = vadd.f32 %v527_v13, %v503_v61  ;;  %v2249_v21 = vpop.permute.xlu0 %516  ;;  %v2252_v23 = vadd.f32 %v527_v13, %v504_v14 }
  0x9c   : > { %v2255_v24 = vadd.f32 %v2249_v21, %v493_v6  ;;  %v602_v33 = vadd.f32 0.5, %v586_v15  ;;  %v682_v40 = vadd.f32 1.0, %v666_v16  ;;  %v617_v44 = vmul.f32 %v601_v29, %v2202_v34 }
  0x9d   : > { %v557_v28 = vmul.f32 1.1915, %v541_v18  ;;  %v653_v31 = vmul.f32 2.383, %v541_v18  ;;  %v558_v32 = vmul.f32 1.1915, %v542_v19  ;;  %v2261_v56 = vadd.f32 %v2249_v21, %v494_v36 }
  0x9e   : > { %v654_v39 = vmul.f32 2.383, %v542_v19  ;;  %v559_v46 = vmul.f32 1.1915, %v543_v20  ;;  %v618_v53 = vmul.f32 %v602_v33, %v2205_v38  ;;  %1875 = vrcp.f32 %v682_v40 }
  0x9f   : > { %v573_v41 = vadd.f32 1.5957, %v557_v28  ;;  %v669_v45 = vmul.f32 %v653_v31, %v541_v18  ;;  %v574_v52 = vadd.f32 1.5957, %v558_v32  ;;  %v633_v60 = vadd.f32 0.0218, %v617_v44 }
  0xa0   : > { %v670_v54 = vmul.f32 %v654_v39, %v542_v19  ;;  %v575_v59 = vadd.f32 1.5957, %v559_v46  ;;  %v587_v5 = vmul.f32 %v571_v17, %v2210_v51  ;;  %v1874_v6 = vpop.eup %1873  ;;  %v655_v50 = vmul.f32 2.383, %v543_v20 }
  0xa1   : > { %v589_v57 = vmul.f32 %v573_v41, %v541_v18  ;;  %v685_v58 = vadd.f32 1.0, %v669_v45  ;;  %v590_v35 = vmul.f32 %v574_v52, %v542_v19  ;;  %v634_v38 = vadd.f32 0.0218, %v618_v53 }
  0xa2   : > { %v686_v43 = vadd.f32 1.0, %v670_v54  ;;  %v591_v7 = vmul.f32 %v575_v59, %v543_v20  ;;  %v603_v37 = vadd.f32 0.5, %v587_v5  ;;  %v671_v47 = vmul.f32 %v655_v50, %v543_v20 }
  0xa3   : > { %v605_v34 = vadd.f32 0.5, %v589_v57  ;;  %1877 = vrcp.f32 %v685_v58  ;;  %v606_v8 = vadd.f32 0.5, %v590_v35  ;;  %v683_v10 = vadd.f32 1.0, %v667_v22 }
  0xa4   : > { %1879 = vrcp.f32 %v686_v43  ;;  %v607_v36 = vadd.f32 0.5, %v591_v7  ;;  %v1876_v48 = vpop.eup %1875  ;;  %v619_v61 = vmul.f32 %v603_v37, %v2210_v51  ;;  %v560_v0 = vmul.f32 1.1915, %v2252_v23 }
  0xa5   : > { %v621_v9 = vmul.f32 %v605_v34, %v541_v18  ;;  %v622_v11 = vmul.f32 %v606_v8, %v542_v19  ;;  %v588_v1 = vmul.f32 %v572_v25, %v2215_v55  ;;  %v713_v14 = vmul.f32 %v1874_v6, %v633_v60 }
  0xa6   : > { %v623_v15 = vmul.f32 %v607_v36, %v543_v20  ;;  %v687_v16 = vadd.f32 1.0, %v671_v47  ;;  %v714_v28 = vmul.f32 %v1876_v48, %v634_v38  ;;  %1881 = vrcp.f32 %v683_v10 }
  0xa7   : > { %v637_v13 = vadd.f32 0.0218, %v621_v9  ;;  %v638_v17 = vadd.f32 0.0218, %v622_v11  ;;  %v576_v29 = vadd.f32 1.5957, %v560_v0  ;;  %v668_v25 = vmul.f32 %v652_v27, %v2215_v55 }
  0xa8   : > { %v635_v31 = vadd.f32 0.0218, %v619_v61  ;;  %1883 = vrcp.f32 %v687_v16  ;;  %v604_v22 = vadd.f32 0.5, %v588_v1  ;;  %v656_v19 = vmul.f32 2.383, %v2252_v23 }
  0xa9   : > { %v1878_v18 = vpop.eup %1877  ;;  %v592_v33 = vmul.f32 %v576_v29, %v2252_v23  ;;  %v549_v39 = vmul.f32 1.1915, %v2255_v24  ;;  %v639_v40 = vadd.f32 0.0218, %v623_v15  ;;  %v684_v52 = vadd.f32 1.0, %v668_v25 }
  0xaa   : > { %v1880_v32 = vpop.eup %1879  ;;  %v717_v51 = vmul.f32 %v1878_v18, %v637_v13  ;;  %v620_v41 = vmul.f32 %v604_v22, %v2215_v55  ;;  %v672_v44 = vmul.f32 %v656_v19, %v2252_v23  ;;  %v2275_v54 = vadd.f32 %v2249_v21, %v2235_v62 }
  0xab   : > { %v718_v20 = vmul.f32 %v1880_v32, %v638_v17  ;;  %v608_v46 = vadd.f32 0.5, %v592_v33  ;;  %v565_v53 = vadd.f32 1.5957, %v549_v39  ;;  %v645_v27 = vmul.f32 2.383, %v2255_v24 }
  0xac   : > { %v729_v45 = vpack.c.bf16 %v717_v51, %v713_v14  ;;  %v688_v58 = vadd.f32 1.0, %v672_v44  ;;  %v1882_v59 = vpop.eup %1881  ;;  %1885 = vrcp.f32 %v684_v52  ;;  %v625_v35 = vadd.f32 0.0218, %v2221_v3 }
  0xad   : > { %v730_v57 = vpack.c.bf16 %v718_v20, %v714_v28  ;;  %v624_v60 = vmul.f32 %v608_v46, %v2252_v23  ;;  %v581_v55 = vmul.f32 %v565_v53, %v2255_v24  ;;  %v636_v5 = vadd.f32 0.0218, %v620_v41 }
  0xae   : > { %780 = vmatpush.bf16.msra.mxu0 %v729_v45  ;;  %v1884_v43 = vpop.eup %1883  ;;  %1887 = vrcp.f32 %v688_v58  ;;  %v661_v62 = vmul.f32 %v645_v27, %v2255_v24  ;;  %v550_v6 = vmul.f32 1.1915, %v2261_v56  ;;  %v715_v34 = vmul.f32 %v1882_v59, %v635_v31 }
  0xaf   : > { %799 = vmatpush.bf16.msra.mxu1 %v730_v57  ;;  %v719_v7 = vmul.f32 %v1884_v43, %v639_v40  ;;  %v640_v50 = vadd.f32 0.0218, %v624_v60  ;;  %v597_v8 = vadd.f32 0.5, %v581_v55  ;;  %v496_v23 = vadd.f32 %v2226_v42, %v2187_v2 }
  0xb0   : > { %v677_v38 = vadd.f32 1.0, %v661_v62  ;;  %v566_v37 = vadd.f32 1.5957, %v550_v6  ;;  %v646_v9 = vmul.f32 2.383, %v2261_v56  ;;  %v705_v25 = vmul.f32 %v2237_v63, %v625_v35 }
  0xb1   : > { %v731_v3 = vpack.c.bf16 %v719_v7, %v715_v34  ;;  %v613_v36 = vmul.f32 %v597_v8, %v2255_v24  ;;  %v626_v47 = vadd.f32 0.0218, %v2223_v4  ;;  %v551_v10 = vmul.f32 1.1915, %v2275_v54 }
  0xb2   : > { %1889 = vrcp.f32 %v677_v38  ;;  %v582_v48 = vmul.f32 %v566_v37, %v2261_v56  ;;  %v662_v11 = vmul.f32 %v646_v9, %v2261_v56  ;;  %v563_v61 = vadd.f32 1.5957, %v2231_v49  ;;  %v1886_v0 = vpop.eup %1885 }
  0xb3   : > { %v536_v2 = vadd.f32 %v2249_v21, %v496_v23  ;;  %818 = vmatpush.bf16.msra.mxu2 %v731_v3  ;;  %v629_v42 = vadd.f32 0.0218, %v613_v36  ;;  %v567_v1 = vadd.f32 1.5957, %v551_v10  ;;  %v643_v13 = vmul.f32 2.383, %v2196_v26 }
  0xb4   : > { %v1888_v24 = vpop.eup %1887  ;;  %v716_v14 = vmul.f32 %v1886_v0, %v636_v5  ;;  %v598_v4 = vadd.f32 0.5, %v582_v48  ;;  %v678_v15 = vadd.f32 1.0, %v662_v11  ;;  %v579_v16 = vmul.f32 %v563_v61, %v2196_v26  ;;  %v1849_v61 = vld [vmem:[%s2661_s3 + $0x8] sm:$0xff]  ;;  %v2323_v0 = vpop.permute.xlu1 %749 }
  0xb5   : > { %v720_v17 = vmul.f32 %v1888_v24, %v640_v50  ;;  %v583_v28 = vmul.f32 %v567_v1, %v2275_v54  ;;  %v647_v29 = vmul.f32 2.383, %v2275_v54  ;;  %v659_v49 = vmul.f32 %v643_v13, %v2196_v26 }
  0xb6   : > { %v614_v21 = vmul.f32 %v598_v4, %v2261_v56  ;;  %1891 = vrcp.f32 %v678_v15  ;;  %v595_v18 = vadd.f32 0.5, %v579_v16  ;;  %v548_v31 = vmul.f32 1.1915, %v2198_v30 }
  0xb7   : > { %v732_v22 = vpack.c.bf16 %v720_v17, %v716_v14  ;;  %v599_v19 = vadd.f32 0.5, %v583_v28  ;;  %v663_v32 = vmul.f32 %v647_v29, %v2275_v54  ;;  %v675_v51 = vadd.f32 1.0, %v659_v49 }
  0xb8   : > { %v1890_v33 = vpop.eup %1889  ;;  %v630_v39 = vadd.f32 0.0218, %v614_v21  ;;  %v552_v20 = vmul.f32 1.1915, %v536_v2  ;;  %v564_v40 = vadd.f32 1.5957, %v548_v31  ;;  %v611_v44 = vmul.f32 %v595_v18, %v2196_v26 }
  0xb9   : > { %837 = vmatpush.bf16.msra.mxu3 %v732_v22  ;;  %v709_v41 = vmul.f32 %v1890_v33, %v629_v42  ;;  %v679_v56 = vadd.f32 1.0, %v663_v32  ;;  %1893 = vrcp.f32 %v675_v51  ;;  %v615_v45 = vmul.f32 %v599_v19, %v2275_v54  ;;  %v1848_v26 = vld [vmem:[%s2661_s3] sm:$0xff] }
  0xba   : > { %v568_v46 = vadd.f32 1.5957, %v552_v20  ;;  %v580_v52 = vmul.f32 %v564_v40, %v2198_v30  ;;  %v644_v53 = vmul.f32 2.383, %v2198_v30  ;;  %v648_v58 = vmul.f32 2.383, %v536_v2 }
  0xbb   : > { %v725_v57 = vpack.c.bf16 %v709_v41, %v705_v25  ;;  %1895 = vrcp.f32 %v679_v56  ;;  %v706_v54 = vmul.f32 %v2245_v12, %v626_v47  ;;  %v627_v43 = vadd.f32 0.0218, %v611_v44 }
  0xbc   : > { %v1892_v63 = vpop.eup %1891  ;;  %v584_v27 = vmul.f32 %v568_v46, %v536_v2  ;;  %v596_v59 = vadd.f32 0.5, %v580_v52  ;;  %v660_v60 = vmul.f32 %v644_v53, %v2198_v30  ;;  %v664_v35 = vmul.f32 %v648_v58, %v536_v2  ;;  %v740_v1 = vpop.permute.xlu1 %739 }
  0xbd   : > { %781 = vmatpush.bf16.msra.mxu0 %v725_v57  ;;  %v710_v55 = vmul.f32 %v1892_v63, %v630_v39  ;;  %v631_v5 = vadd.f32 0.0218, %v615_v45 }
  0xbe   : > { %v600_v62 = vadd.f32 0.5, %v584_v27  ;;  %v676_v6 = vadd.f32 1.0, %v660_v60  ;;  %v680_v50 = vadd.f32 1.0, %v664_v35  ;;  %v612_v8 = vmul.f32 %v596_v59, %v2198_v30 }
  0xbf   : > { %v1894_v34 = vpop.eup %1893  ;;  %v726_v7 = vpack.c.bf16 %v710_v55, %v706_v54 }
  0xc0   : > { %v616_v23 = vmul.f32 %v600_v62, %v536_v2  ;;  %1897 = vrcp.f32 %v676_v6  ;;  %1806 = vmatmul.msk.bf16.vlgmr.msra.gmra.mxu0 %vm767_vm0, %v1848_v26  ;;  %v707_v12 = vmul.f32 %v1894_v34, %v627_v43  ;;  %v628_v3 = vadd.f32 0.0218, %v612_v8  ;;  %v2325_v2 = vpop.permute.xlu2 %754 }
  0xc1   : > { %v1896_v38 = vpop.eup %1895  ;;  %800 = vmatpush.bf16.msra.mxu1 %v726_v7  ;;  %1899 = vrcp.f32 %v680_v50 }
  0xc2   : > { %v711_v37 = vmul.f32 %v1896_v38, %v631_v5  ;;  %v632_v36 = vadd.f32 0.0218, %v616_v23 }
  0xc4   : > { %v727_v9 = vpack.c.bf16 %v711_v37, %v707_v12  ;;  %1808 = vmatmul.msk.bf16.vlgmr.msra.gmra.mxu1 %vm767_vm0, %v1848_v26 }
  0xc6   : > { %v1898_v47 = vpop.eup %1897  ;;  %819 = vmatpush.bf16.msra.mxu2 %v727_v9 }
  0xc7   : > { %v1900_v10 = vpop.eup %1899  ;;  %v708_v48 = vmul.f32 %v1898_v47, %v628_v3 }
  0xc8   : > { %v712_v11 = vmul.f32 %v1900_v10, %v632_v36  ;;  %v2327_v4 = vpop.permute.xlu2 %744 }
  0xc9   : > { %1810 = vmatmul.msk.bf16.vlgmr.msra.gmra.mxu2 %vm767_vm0, %v1848_v26 }
  0xca   : > { %v728_v30 = vpack.c.bf16 %v712_v11, %v708_v48 }
  0xcc   : > { %838 = vmatpush.bf16.msra.mxu3 %v728_v30 }
  0xcf   : > { %1812 = vmatmul.msk.bf16.vlgmr.msra.gmra.mxu3 %vm767_vm0, %v1848_v26 }
  0xd0   : > { %1807 = vmatmul.msk.bf16.gmra.mxu0 %vm767_vm0, %v1849_v61 }
  0xd4   : > { %1809 = vmatmul.msk.bf16.gmra.mxu1 %vm767_vm0, %v1849_v61 }
  0xd9   : > { %1811 = vmatmul.msk.bf16.gmra.mxu2 %vm767_vm0, %v1849_v61 }
  0xdf   : > { %1813 = vmatmul.msk.bf16.gmra.mxu3 %vm767_vm0, %v1849_v61 }
 0x13d   : > { %v783_v42 = vpop.f32.mrf.mxu0 }
 0x13e   : > { %v784_v13 = vadd.f32 %v783_v42, %v740_v1 }
 0x140   : > { %v946_v15 = vmul.f32 2.383, %v784_v13  ;;  %v850_v28 = vmul.f32 1.1915, %v784_v13 }
 0x141   : > { %v802_v24 = vpop.f32.mrf.mxu1 }
 0x142   : > { %v803_v14 = vadd.f32 %v802_v24, %v740_v1  ;;  %v866_v31 = vadd.f32 1.5957, %v850_v28  ;;  %v962_v22 = vmul.f32 %v946_v15, %v784_v13 }
 0x144   : > { %v851_v29 = vmul.f32 1.1915, %v803_v14  ;;  %v947_v49 = vmul.f32 2.383, %v803_v14  ;;  %v882_v51 = vmul.f32 %v866_v31, %v784_v13  ;;  %v978_v39 = vadd.f32 1.0, %v962_v22 }
 0x145   : > { %v785_v16 = vpop.f32.mrf.mxu0 }
 0x146   : > { %v786_v17 = vadd.f32 %v785_v16, %v2327_v4  ;;  %v867_v19 = vadd.f32 1.5957, %v851_v29  ;;  %v898_v41 = vadd.f32 0.5, %v882_v51  ;;  %v963_v56 = vmul.f32 %v947_v49, %v803_v14 }
 0x147   : > { %1901 = vrcp.f32 %v978_v39 }
 0x148   : > { %v950_v21 = vmul.f32 2.383, %v786_v17  ;;  %v883_v33 = vmul.f32 %v867_v19, %v803_v14  ;;  %v854_v40 = vmul.f32 1.1915, %v786_v17  ;;  %v914_v54 = vmul.f32 %v898_v41, %v784_v13 }
 0x149   : > { %v804_v18 = vpop.f32.mrf.mxu1  ;;  %v979_v35 = vadd.f32 1.0, %v963_v56 }
 0x14a   : > { %v2331_v32 = vadd.f32 %v804_v18, %v2327_v4  ;;  %v966_v44 = vmul.f32 %v950_v21, %v786_v17  ;;  %v870_v57 = vadd.f32 1.5957, %v854_v40  ;;  %v899_v63 = vadd.f32 0.5, %v883_v33 }
 0x14b   : > { %v930_v10 = vadd.f32 0.0218, %v914_v54 }
 0x14c   : > { %v821_v25 = vpop.f32.mrf.mxu2  ;;  %v951_v45 = vmul.f32 2.383, %v2331_v32  ;;  %v855_v52 = vmul.f32 1.1915, %v2331_v32  ;;  %v982_v58 = vadd.f32 1.0, %v966_v44  ;;  %v886_v26 = vmul.f32 %v870_v57, %v786_v17 }
 0x14d   : > { %v788_v20 = vpop.f32.mrf.mxu0  ;;  %v2336_v53 = vadd.f32 %v821_v25, %v740_v1  ;;  %v915_v50 = vmul.f32 %v899_v63, %v803_v14  ;;  %v1902_v11 = vpop.eup %1901 }
 0x14e   : > { %v789_v46 = vadd.f32 %v788_v20, %v2323_v0  ;;  %v871_v55 = vadd.f32 1.5957, %v855_v52  ;;  %1903 = vrcp.f32 %v982_v58  ;;  %v902_v7 = vadd.f32 0.5, %v886_v26 }
 0x14f   : > { %v2340_v34 = vmul.f32 2.383, %v2336_v53  ;;  %v967_v8 = vmul.f32 %v951_v45, %v2331_v32  ;;  %v2350_v14 = vadd.f32 0.0218, %v915_v50  ;;  %v2355_v31 = vmul.f32 %v1902_v11, %v930_v10 }
 0x150   : > { %v954_v27 = vmul.f32 2.383, %v789_v46  ;;  %v858_v59 = vmul.f32 1.1915, %v789_v46  ;;  %v918_v47 = vmul.f32 %v902_v7, %v786_v17  ;;  %v887_v48 = vmul.f32 %v871_v55, %v2331_v32 }
 0x151   : > { %v807_v60 = vpop.f32.mrf.mxu1  ;;  %v983_v15 = vadd.f32 1.0, %v967_v8  ;;  %v852_v8 = vmul.f32 1.1915, %v2336_v53 }
 0x152   : > { %v840_v43 = vpop.f32.mrf.mxu3  ;;  %v808_v5 = vadd.f32 %v807_v60, %v2323_v0  ;;  %v874_v62 = vadd.f32 1.5957, %v858_v59  ;;  %v970_v6 = vmul.f32 %v954_v27, %v789_v46  ;;  %v934_v24 = vadd.f32 0.0218, %v918_v47 }
 0x153   : > { %v2343_v23 = vadd.f32 %v840_v43, %v740_v1  ;;  %v903_v22 = vadd.f32 0.5, %v887_v48 }
 0x154   : > { %v823_v38 = vpop.f32.mrf.mxu2  ;;  %v955_v12 = vmul.f32 2.383, %v808_v5  ;;  %v890_v37 = vmul.f32 %v874_v62, %v789_v46  ;;  %v859_v9 = vmul.f32 1.1915, %v808_v5  ;;  %v986_v36 = vadd.f32 1.0, %v970_v6  ;;  %v1904_v16 = vpop.eup %1903 }
 0x155   : > { %v790_v3 = vpop.f32.mrf.mxu0  ;;  %v2347_v30 = vadd.f32 %v823_v38, %v2327_v4  ;;  %v2353_v28 = vmul.f32 2.383, %v2343_v23  ;;  %v2364_v44 = vmul.f32 %v1904_v16, %v934_v24  ;;  %v919_v27 = vmul.f32 %v903_v22, %v2331_v32 }
 0x156   : > { %v791_v61 = vadd.f32 %v790_v3, %v2325_v2  ;;  %v906_v42 = vadd.f32 0.5, %v890_v37  ;;  %v875_v13 = vadd.f32 1.5957, %v859_v9  ;;  %v971_v1 = vmul.f32 %v955_v12, %v808_v5 }
 0x157   : > { %1905 = vrcp.f32 %v986_v36  ;;  %v2358_v19 = vmul.f32 2.383, %v2347_v30  ;;  %v1030_v43 = vpack.c.bf16 %v2364_v44, %v2355_v31  ;;  %v856_v37 = vmul.f32 1.1915, %v2347_v30 }
 0x158   : > { %v958_v17 = vmul.f32 2.383, %v791_v61  ;;  %v862_v29 = vmul.f32 1.1915, %v791_v61  ;;  %v891_v49 = vmul.f32 %v875_v13, %v808_v5  ;;  %v922_v18 = vmul.f32 %v906_v42, %v789_v46 }
 0x159   : > { %v809_v21 = vpop.f32.mrf.mxu1  ;;  %v987_v41 = vadd.f32 1.0, %v971_v1  ;;  %1907 = vrcp.f32 %v979_v35  ;;  %v935_v42 = vadd.f32 0.0218, %v919_v27  ;;  %v868_v1 = vadd.f32 1.5957, %v852_v8 }
 0x15a   : > { %v842_v51 = vpop.f32.mrf.mxu3  ;;  %v810_v33 = vadd.f32 %v809_v21, %v2325_v2  ;;  %v878_v25 = vadd.f32 1.5957, %v862_v29  ;;  %v974_v39 = vmul.f32 %v958_v17, %v791_v61  ;;  %v907_v40 = vadd.f32 0.5, %v891_v49 }
 0x15b   : > { %v2362_v20 = vadd.f32 %v842_v51, %v2327_v4  ;;  %v938_v63 = vadd.f32 0.0218, %v922_v18  ;;  %v872_v18 = vadd.f32 1.5957, %v856_v37  ;;  %v965_v44 = vmul.f32 %v2353_v28, %v2343_v23 }
 0x15c   : > { %v826_v56 = vpop.f32.mrf.mxu2  ;;  %v959_v45 = vmul.f32 2.383, %v810_v33  ;;  %v894_v46 = vmul.f32 %v878_v25, %v791_v61  ;;  %v990_v52 = vadd.f32 1.0, %v974_v39  ;;  %v863_v57 = vmul.f32 1.1915, %v810_v33 }
 0x15d   : > { %v2367_v58 = vadd.f32 %v826_v56, %v2323_v0  ;;  %v1906_v26 = vpop.eup %1905  ;;  %v923_v55 = vmul.f32 %v907_v40, %v808_v5  ;;  %v2374_v62 = vmul.f32 2.383, %v2362_v20 }
 0x15e   : > { %v910_v59 = vadd.f32 0.5, %v894_v46  ;;  %1909 = vrcp.f32 %v990_v52  ;;  %v879_v4 = vadd.f32 1.5957, %v863_v57  ;;  %v975_v60 = vmul.f32 %v959_v45, %v810_v33 }
 0x15f   : > { %v956_v54 = vmul.f32 2.383, %v2367_v58  ;;  %1911 = vrcp.f32 %v987_v41  ;;  %v860_v32 = vmul.f32 1.1915, %v2367_v58  ;;  %v1908_v9 = vpop.eup %1907  ;;  %v1018_v36 = vmul.f32 %v1906_v26, %v938_v63 }
 0x160   : > { %v926_v6 = vmul.f32 %v910_v59, %v791_v61  ;;  %v895_v7 = vmul.f32 %v879_v4, %v810_v33  ;;  %v991_v50 = vadd.f32 1.0, %v975_v60  ;;  %1913 = vrcp.f32 %v983_v15 }
 0x161   : > { %v972_v35 = vmul.f32 %v956_v54, %v2367_v58  ;;  %v939_v47 = vadd.f32 0.0218, %v923_v55  ;;  %v876_v10 = vadd.f32 1.5957, %v860_v32  ;;  %v1011_v21 = vmul.f32 %v1908_v9, %v2350_v14 }
 0x162   : > { %v845_v38 = vpop.f32.mrf.mxu3  ;;  %v942_v12 = vadd.f32 0.0218, %v926_v6  ;;  %v911_v5 = vadd.f32 0.5, %v895_v7  ;;  %1915 = vrcp.f32 %v991_v50  ;;  %v884_v46 = vmul.f32 %v868_v1, %v2336_v53 }
 0x163   : > { %v846_v3 = vadd.f32 %v845_v38, %v2323_v0  ;;  %v988_v13 = vadd.f32 1.0, %v972_v35  ;;  %v892_v29 = vmul.f32 %v876_v10, %v2367_v58  ;;  %v964_v14 = vmul.f32 %v2340_v34, %v2336_v53  ;;  %v2393_v35 = vld [vmem:[%s2663_s5] sm:$0xff] }
 0x164   : > { %v1910_v48 = vpop.eup %1909  ;;  %v828_v11 = vpop.f32.mrf.mxu2  ;;  %v927_v61 = vmul.f32 %v911_v5, %v810_v33  ;;  %v888_v26 = vmul.f32 %v872_v18, %v2347_v30  ;;  %v900_v34 = vadd.f32 0.5, %v884_v46  ;;  %v968_v38 = vmul.f32 %v2358_v19, %v2347_v30 }
 0x165   : > { %v1912_v24 = vpop.eup %1911  ;;  %v957_v15 = vmul.f32 2.383, %v846_v3  ;;  %v829_v16 = vadd.f32 %v828_v11, %v2325_v2  ;;  %v1022_v17 = vmul.f32 %v1910_v48, %v942_v12  ;;  %v861_v0 = vmul.f32 1.1915, %v846_v3 }
 0x166   : > { %v943_v49 = vadd.f32 0.0218, %v927_v61  ;;  %v1914_v22 = vpop.eup %1913  ;;  %v908_v33 = vadd.f32 0.5, %v892_v29  ;;  %v1019_v41 = vmul.f32 %v1912_v24, %v939_v47  ;;  %1917 = vrcp.f32 %v988_v13 }
 0x167   : > { %v960_v51 = vmul.f32 2.383, %v829_v16  ;;  %v1034_v25 = vpack.c.bf16 %v1022_v17, %v1018_v36  ;;  %v864_v39 = vmul.f32 1.1915, %v829_v16  ;;  %v877_v56 = vadd.f32 1.5957, %v861_v0 }
 0x168   : > { %v1916_v40 = vpop.eup %1915  ;;  %v973_v45 = vmul.f32 %v957_v15, %v846_v3  ;;  %v1015_v59 = vmul.f32 %v1914_v22, %v935_v42  ;;  %v924_v4 = vmul.f32 %v908_v33, %v2367_v58  ;;  %v904_v37 = vadd.f32 0.5, %v888_v26 }
 0x169   : > { %1084 = vmatpush.bf16.msrb.mxu0 %v1034_v25  ;;  %v1023_v52 = vmul.f32 %v1916_v40, %v943_v49  ;;  %v880_v57 = vadd.f32 1.5957, %v864_v39  ;;  %v976_v63 = vmul.f32 %v960_v51, %v829_v16  ;;  %v893_v60 = vmul.f32 %v877_v56, %v846_v3 }
 0x16a   : > { %v847_v27 = vpop.f32.mrf.mxu3  ;;  %v989_v32 = vadd.f32 1.0, %v973_v45  ;;  %v1031_v12 = vpack.c.bf16 %v1015_v59, %v1011_v21  ;;  %v940_v5 = vadd.f32 0.0218, %v924_v4  ;;  %v980_v10 = vadd.f32 1.0, %v964_v14 }
 0x16b   : > { %v848_v54 = vadd.f32 %v847_v27, %v2325_v2  ;;  %v1035_v55 = vpack.c.bf16 %v1023_v52, %v1019_v41  ;;  %v896_v6 = vmul.f32 %v880_v57, %v829_v16  ;;  %v992_v7 = vadd.f32 1.0, %v976_v63 }
 0x16c   : > { %v909_v50 = vadd.f32 0.5, %v893_v60  ;;  %v916_v31 = vmul.f32 %v900_v34, %v2336_v53  ;;  %v984_v42 = vadd.f32 1.0, %v968_v38  ;;  %v853_v13 = vmul.f32 1.1915, %v2343_v23 }
 0x16d   : > { %v961_v8 = vmul.f32 2.383, %v848_v54  ;;  %1103 = vmatpush.bf16.msrb.mxu1 %v1035_v55  ;;  %1085 = vmatpush.bf16.msrb.mxu0 %v1030_v43  ;;  %v912_v58 = vadd.f32 0.5, %v896_v6  ;;  %v865_v2 = vmul.f32 1.1915, %v848_v54  ;;  %1919 = vrcp.f32 %v992_v7  ;;  %v1918_v43 = vpop.eup %1917  ;;  %v1851_v6 = vld [vmem:[%s2663_s5 + $0x8] sm:$0xff] }
 0x16e   : > { %v925_v48 = vmul.f32 %v909_v50, %v846_v3  ;;  %1921 = vrcp.f32 %v989_v32  ;;  %v857_v3 = vmul.f32 1.1915, %v2362_v20  ;;  %v969_v1 = vmul.f32 %v2374_v62, %v2362_v20 }
 0x16f   : > { %v928_v9 = vmul.f32 %v912_v58, %v829_v16  ;;  %v881_v36 = vadd.f32 1.5957, %v865_v2  ;;  %v977_v47 = vmul.f32 %v961_v8, %v848_v54  ;;  %1923 = vrcp.f32 %v980_v10  ;;  %v2427_v8 = vpop.permute.xlu0 %1054  ;;  %v1045_v58 = vpop.permute.xlu2 %1044 }
 0x170   : > { %1822 = vmatmul.msk.bf16.vlgmr.msrb.gmra.mxu0 %vm767_vm0, %v2393_v35  ;;  %v920_v53 = vmul.f32 %v904_v37, %v2347_v30  ;;  %v981_v15 = vadd.f32 1.0, %v965_v44  ;;  %v869_v16 = vadd.f32 1.5957, %v853_v13  ;;  %v873_v17 = vadd.f32 1.5957, %v857_v3 }
 0x171   : > { %1104 = vmatpush.bf16.msrb.mxu1 %v1031_v12  ;;  %v944_v19 = vadd.f32 0.0218, %v928_v9  ;;  %v897_v11 = vmul.f32 %v881_v36, %v848_v54  ;;  %v993_v61 = vadd.f32 1.0, %v977_v47  ;;  %v985_v29 = vadd.f32 1.0, %v969_v1 }
 0x172   : > { %v1020_v49 = vmul.f32 %v1918_v43, %v940_v5  ;;  %v941_v22 = vadd.f32 0.0218, %v925_v48  ;;  %v885_v62 = vmul.f32 %v869_v16, %v2343_v23  ;;  %v889_v51 = vmul.f32 %v873_v17, %v2362_v20 }
 0x173   : > { %v913_v24 = vadd.f32 0.5, %v897_v11  ;;  %1925 = vrcp.f32 %v993_v61  ;;  %v1920_v28 = vpop.eup %1919  ;;  %v932_v39 = vadd.f32 0.0218, %v916_v31  ;;  %v936_v33 = vadd.f32 0.0218, %v920_v53 }
 0x174   : > { %1824 = vmatmul.msk.bf16.vlgmr.msrb.gmra.mxu1 %vm767_vm0, %v2393_v35  ;;  %1927 = vrcp.f32 %v984_v42  ;;  %v1024_v21 = vmul.f32 %v1920_v28, %v944_v19  ;;  %v1922_v18 = vpop.eup %1921  ;;  %v901_v41 = vadd.f32 0.5, %v885_v62  ;;  %v905_v56 = vadd.f32 0.5, %v889_v51 }
 0x175   : > { %v929_v0 = vmul.f32 %v913_v24, %v848_v54  ;;  %1929 = vrcp.f32 %v981_v15  ;;  %v1924_v40 = vpop.eup %1923  ;;  %v1021_v52 = vmul.f32 %v1922_v18, %v941_v22 }
 0x176   : > { %1931 = vrcp.f32 %v985_v29  ;;  %v1036_v30 = vpack.c.bf16 %v1024_v21, %v1020_v49  ;;  %v917_v63 = vmul.f32 %v901_v41, %v2343_v23  ;;  %v921_v14 = vmul.f32 %v905_v56, %v2362_v20 }
 0x177   : > { %v945_v25 = vadd.f32 0.0218, %v929_v0  ;;  %v1012_v59 = vmul.f32 %v1924_v40, %v932_v39  ;;  %v2429_v47 = vpop.permute.xlu0 %1049 }
 0x178   : > { %1122 = vmatpush.bf16.msrb.mxu2 %v1036_v30  ;;  %v933_v54 = vadd.f32 0.0218, %v917_v63  ;;  %v937_v55 = vadd.f32 0.0218, %v921_v14 }
 0x179   : > { %v1926_v45 = vpop.eup %1925 }
 0x17a   : > { %v1928_v46 = vpop.eup %1927  ;;  %v1025_v57 = vmul.f32 %v1926_v45, %v945_v25 }
 0x17b   : > { %v1930_v27 = vpop.eup %1929  ;;  %v1016_v4 = vmul.f32 %v1928_v46, %v936_v33  ;;  %v2447_v33 = vpop.permute.xlu1 %1059 }
 0x17c   : > { %v1932_v60 = vpop.eup %1931  ;;  %v1037_v26 = vpack.c.bf16 %v1025_v57, %v1021_v52  ;;  %v1013_v50 = vmul.f32 %v1930_v27, %v933_v54 }
 0x17d   : > { %v1032_v7 = vpack.c.bf16 %v1016_v4, %v1012_v59  ;;  %v1017_v32 = vmul.f32 %v1932_v60, %v937_v55 }
 0x17e   : > { %1141 = vmatpush.bf16.msrb.mxu3 %v1037_v26 }
 0x17f   : > { %1123 = vmatpush.bf16.msrb.mxu2 %v1032_v7  ;;  %v1033_v34 = vpack.c.bf16 %v1017_v32, %v1013_v50 }
 0x180   : > { %1823 = vmatmul.msk.bf16.gmra.mxu0 %vm767_vm0, %v1851_v6 }
 0x182   : > { %1142 = vmatpush.bf16.msrb.mxu3 %v1033_v34  ;;  %1826 = vmatmul.msk.bf16.vlgmr.msrb.gmra.mxu2 %vm767_vm0, %v2393_v35 }
 0x184   : > { %1825 = vmatmul.msk.bf16.gmra.mxu1 %vm767_vm0, %v1851_v6 }
 0x185   : > { %1828 = vmatmul.msk.bf16.vlgmr.msrb.gmra.mxu3 %vm767_vm0, %v2393_v35 }
 0x192   : > { %1827 = vmatmul.msk.bf16.gmra.mxu2 %vm767_vm0, %v1851_v6 }
 0x195   : > { %1829 = vmatmul.msk.bf16.gmra.mxu3 %vm767_vm0, %v1851_v6 }
 0x1ed   : > { %v1087_v23 = vpop.f32.mrf.mxu0 }
 0x1ee   : > { %v1088_v38 = vadd.f32 %v1087_v23, %v1045_v58 }
 0x1f0   : > { %v1154_v37 = vmul.f32 1.1915, %v1088_v38  ;;  %v1250_v36 = vmul.f32 2.383, %v1088_v38 }
 0x1f1   : > { %v1106_v20 = vpop.f32.mrf.mxu1 }
 0x1f2   : > { %v1107_v12 = vadd.f32 %v1106_v20, %v1045_v58  ;;  %v1170_v44 = vadd.f32 1.5957, %v1154_v37  ;;  %v1266_v19 = vmul.f32 %v1250_v36, %v1088_v38 }
 0x1f4   : > { %v1155_v9 = vmul.f32 1.1915, %v1107_v12  ;;  %v1251_v10 = vmul.f32 2.383, %v1107_v12  ;;  %v1186_v13 = vmul.f32 %v1170_v44, %v1088_v38  ;;  %v1282_v49 = vadd.f32 1.0, %v1266_v19 }
 0x1f5   : > { %v1089_v2 = vpop.f32.mrf.mxu0 }
 0x1f6   : > { %v2432_v35 = vadd.f32 %v1089_v2, %v2429_v47  ;;  %v1171_v43 = vadd.f32 1.5957, %v1155_v9  ;;  %v1267_v3 = vmul.f32 %v1251_v10, %v1107_v12  ;;  %v1202_v17 = vadd.f32 0.5, %v1186_v13 }
 0x1f7   : > { %1933 = vrcp.f32 %v1282_v49 }
 0x1f8   : > { %v1254_v1 = vmul.f32 2.383, %v2432_v35  ;;  %v1187_v53 = vmul.f32 %v1171_v43, %v1107_v12  ;;  %v1158_v62 = vmul.f32 1.1915, %v2432_v35  ;;  %v1283_v39 = vadd.f32 1.0, %v1267_v3 }
 0x1f9   : > { %v1108_v5 = vpop.f32.mrf.mxu1  ;;  %v1218_v45 = vmul.f32 %v1202_v17, %v1088_v38 }
 0x1fa   : > { %v2436_v11 = vadd.f32 %v1108_v5, %v2429_v47  ;;  %v1203_v22 = vadd.f32 0.5, %v1187_v53  ;;  %v1270_v51 = vmul.f32 %v1254_v1, %v2432_v35  ;;  %v1174_v55 = vadd.f32 1.5957, %v1158_v62 }
 0x1fb   : > { %1935 = vrcp.f32 %v1283_v39  ;;  %v2462_v50 = vadd.f32 0.0218, %v1218_v45 }
 0x1fc   : > { %v1255_v29 = vmul.f32 2.383, %v2436_v11  ;;  %v1159_v46 = vmul.f32 1.1915, %v2436_v11  ;;  %v2458_v4 = vmul.f32 %v1203_v22, %v1107_v12  ;;  %v1190_v10 = vmul.f32 %v1174_v55, %v2432_v35 }
 0x1fd   : > { %v1092_v48 = vpop.f32.mrf.mxu0  ;;  %v2468_v44 = vpop.eup %1933 }
 0x1fe   : > { %v1093_v31 = vadd.f32 %v1092_v48, %v2427_v8  ;;  %v2453_v52 = vmul.f32 %v1255_v29, %v2436_v11  ;;  %v1286_v48 = vadd.f32 1.0, %v1270_v51  ;;  %v1206_v3 = vadd.f32 0.5, %v1190_v10 }
 0x1ff   : > { %v1235_v55 = vadd.f32 0.0218, %v2458_v4 }
 0x200   : > { %v1162_v61 = vmul.f32 1.1915, %v1093_v31  ;;  %v1258_v42 = vmul.f32 2.383, %v1093_v31 }
 0x201   : > { %v1111_v24 = vpop.f32.mrf.mxu1 }
 0x202   : > { %v1178_v15 = vadd.f32 1.5957, %v1162_v61  ;;  %v1274_v28 = vmul.f32 %v1258_v42, %v1093_v31  ;;  %v2440_v16 = vadd.f32 %v1111_v24, %v2427_v8  ;;  %v2473_v42 = vpop.eup %1935 }
 0x204   : > { %v1194_v21 = vmul.f32 %v1178_v15, %v1093_v31  ;;  %v1163_v0 = vmul.f32 1.1915, %v2440_v16  ;;  %v1259_v18 = vmul.f32 2.383, %v2440_v16  ;;  %v1290_v41 = vadd.f32 1.0, %v1274_v28 }
 0x205   : > { %v1125_v30 = vpop.f32.mrf.mxu2  ;;  %v1094_v25 = vpop.f32.mrf.mxu0 }
 0x206   : > { %v2449_v40 = vadd.f32 %v1125_v30, %v1045_v58  ;;  %v1179_v56 = vadd.f32 1.5957, %v1163_v0  ;;  %v1275_v57 = vmul.f32 %v1259_v18, %v2440_v16  ;;  %v1095_v63 = vadd.f32 %v1094_v25, %v2447_v33 }
 0x207   : > { %v1210_v27 = vadd.f32 0.5, %v1194_v21  ;;  %1937 = vrcp.f32 %v1290_v41  ;;  %v1222_v21 = vmul.f32 %v1206_v3, %v2432_v35  ;;  %v1175_v41 = vadd.f32 1.5957, %v1159_v46 }
 0x208   : > { %v1144_v14 = vpop.f32.mrf.mxu3  ;;  %v1195_v59 = vmul.f32 %v1179_v56, %v2440_v16  ;;  %v1166_v60 = vmul.f32 1.1915, %v1095_v63  ;;  %v1262_v26 = vmul.f32 2.383, %v1095_v63  ;;  %v1156_v6 = vmul.f32 1.1915, %v2449_v40 }
 0x209   : > { %v1113_v54 = vpop.f32.mrf.mxu1  ;;  %v2464_v32 = vadd.f32 %v1144_v14, %v1045_v58  ;;  %v1291_v23 = vadd.f32 1.0, %v1275_v57  ;;  %v1226_v5 = vmul.f32 %v1210_v27, %v1093_v31  ;;  %v1252_v37 = vmul.f32 2.383, %v2449_v40 }
 0x20a   : > { %v1114_v7 = vadd.f32 %v1113_v54, %v2447_v33  ;;  %v1211_v34 = vadd.f32 0.5, %v1195_v59  ;;  %v1182_v20 = vadd.f32 1.5957, %v1166_v60  ;;  %v1278_v2 = vmul.f32 %v1262_v26, %v1095_v63 }
 0x20b   : > { %v1253_v13 = vmul.f32 2.383, %v2464_v32  ;;  %1939 = vrcp.f32 %v1291_v23  ;;  %v1242_v15 = vadd.f32 0.0218, %v1226_v5  ;;  %v2480_v0 = vmul.f32 %v1252_v37, %v2449_v40 }
 0x20c   : > { %v1167_v38 = vmul.f32 1.1915, %v1114_v7  ;;  %v1263_v12 = vmul.f32 2.383, %v1114_v7  ;;  %v1198_v36 = vmul.f32 %v1182_v20, %v1095_v63  ;;  %v1294_v58 = vadd.f32 1.0, %v1278_v2 }
 0x20d   : > { %v1127_v9 = vpop.f32.mrf.mxu2  ;;  %v1938_v1 = vpop.eup %1937  ;;  %v1227_v28 = vmul.f32 %v1211_v34, %v2440_v16  ;;  %v2484_v62 = vmul.f32 1.1915, %v2464_v32  ;;  %v2487_v51 = vmul.f32 %v1253_v13, %v2464_v32  ;;  %v1287_v14 = vadd.f32 1.0, %v2453_v52 }
 0x20e   : > { %v2471_v43 = vadd.f32 %v1127_v9, %v2429_v47  ;;  %v1183_v19 = vadd.f32 1.5957, %v1167_v38  ;;  %v1279_v61 = vmul.f32 %v1263_v12, %v1114_v7  ;;  %v1214_v31 = vadd.f32 0.5, %v1198_v36 }
 0x20f   : > { %1941 = vrcp.f32 %v1294_v58  ;;  %v1322_v30 = vmul.f32 %v1938_v1, %v1242_v15  ;;  %v1243_v39 = vadd.f32 0.0218, %v1227_v28  ;;  %v1191_v26 = vmul.f32 %v1175_v41, %v2436_v11 }
 0x210   : > { %v1146_v24 = vpop.f32.mrf.mxu3  ;;  %v1199_v53 = vmul.f32 %v1183_v19, %v1114_v7  ;;  %v1256_v17 = vmul.f32 2.383, %v2471_v43  ;;  %v1295_v29 = vadd.f32 1.0, %v1279_v61  ;;  %v1230_v49 = vmul.f32 %v1214_v31, %v1095_v63 }
 0x211   : > { %v1160_v18 = vmul.f32 1.1915, %v2471_v43  ;;  %1943 = vrcp.f32 %v1286_v48  ;;  %v1940_v35 = vpop.eup %1939  ;;  %v2493_v45 = vadd.f32 %v1146_v24, %v2429_v47  ;;  %v1238_v63 = vadd.f32 0.0218, %v1222_v21 }
 0x212   : > { %v1215_v22 = vadd.f32 0.5, %v1199_v53  ;;  %1945 = vrcp.f32 %v1295_v29  ;;  %v1246_v16 = vadd.f32 0.0218, %v1230_v49  ;;  %v2490_v56 = vmul.f32 %v1256_v17, %v2471_v43 }
 0x213   : > { %v1176_v54 = vadd.f32 1.5957, %v1160_v18  ;;  %1947 = vrcp.f32 %v1287_v14  ;;  %v1323_v52 = vmul.f32 %v1940_v35, %v1243_v39  ;;  %v1207_v2 = vadd.f32 0.5, %v1191_v26 }
 0x214   : > { %v1231_v25 = vmul.f32 %v1215_v22, %v1114_v7  ;;  %v1172_v7 = vadd.f32 1.5957, %v1156_v6  ;;  %v1257_v48 = vmul.f32 2.383, %v2493_v45  ;;  %v1314_v61 = vmul.f32 %v2468_v44, %v2462_v50  ;;  %v2517_v50 = vld [vmem:[%s2665_s7] sm:$0xff] }
 0x215   : > { %v1130_v57 = vpop.f32.mrf.mxu2  ;;  %v1942_v27 = vpop.eup %1941  ;;  %v1192_v9 = vmul.f32 %v1176_v54, %v2471_v43  ;;  %v1223_v6 = vmul.f32 %v1207_v2, %v2436_v11  ;;  %v1315_v49 = vmul.f32 %v2473_v42, %v1235_v55  ;;  %v1161_v44 = vmul.f32 1.1915, %v2493_v45 }
 0x216   : > { %v2497_v59 = vadd.f32 %v1130_v57, %v2427_v8  ;;  %v1247_v60 = vadd.f32 0.0218, %v1231_v25  ;;  %v1326_v46 = vmul.f32 %v1942_v27, %v1246_v16  ;;  %v1188_v3 = vmul.f32 %v1172_v7, %v2449_v40 }
 0x217   : > { %v1944_v34 = vpop.eup %1943  ;;  %v1239_v31 = vadd.f32 0.0218, %v1223_v6  ;;  %v1208_v11 = vadd.f32 0.5, %v1192_v9  ;;  %v1273_v18 = vmul.f32 %v1257_v48, %v2493_v45  ;;  %v1288_v26 = vadd.f32 1.0, %v2490_v56 }
 0x218   : > { %v1164_v47 = vmul.f32 1.1915, %v2497_v59  ;;  %v1260_v23 = vmul.f32 2.383, %v2497_v59  ;;  %v1149_v20 = vpop.f32.mrf.mxu3  ;;  %v1946_v38 = vpop.eup %1945  ;;  %v1338_v5 = vpack.c.bf16 %v1326_v46, %v1322_v30  ;;  %v1318_v37 = vmul.f32 %v1944_v34, %v1238_v63 }
 0x219   : > { %v1150_v12 = vadd.f32 %v1149_v20, %v2427_v8  ;;  %v1327_v10 = vmul.f32 %v1946_v38, %v1247_v60  ;;  %v1948_v1 = vpop.eup %1947  ;;  %v1204_v63 = vadd.f32 0.5, %v1188_v3  ;;  %v1224_v14 = vmul.f32 %v1208_v11, %v2471_v43 }
 0x21a   : > { %v1180_v36 = vadd.f32 1.5957, %v1164_v47  ;;  %v1276_v4 = vmul.f32 %v1260_v23, %v2497_v59  ;;  %1388 = vmatpush.bf16.msra.mxu0 %v1338_v5  ;;  %v1334_v28 = vpack.c.bf16 %v1318_v37, %v1314_v61  ;;  %v1319_v21 = vmul.f32 %v1948_v1, %v1239_v31 }
 0x21b   : > { %v1165_v58 = vmul.f32 1.1915, %v1150_v12  ;;  %v1261_v19 = vmul.f32 2.383, %v1150_v12  ;;  %v1339_v13 = vpack.c.bf16 %v1327_v10, %v1323_v52  ;;  %v1284_v7 = vadd.f32 1.0, %v2480_v0 }
 0x21c   : > { %v1196_v8 = vmul.f32 %v1180_v36, %v2497_v59  ;;  %v1292_v17 = vadd.f32 1.0, %v1276_v4  ;;  %v1335_v35 = vpack.c.bf16 %v1319_v21, %v1315_v49  ;;  %v1173_v43 = vadd.f32 1.5957, %v2484_v62 }
 0x21d   : > { %v1181_v24 = vadd.f32 1.5957, %v1165_v58  ;;  %v1277_v53 = vmul.f32 %v1261_v19, %v1150_v12  ;;  %v1132_v15 = vpop.f32.mrf.mxu2  ;;  %1407 = vmatpush.bf16.msra.mxu1 %v1339_v13  ;;  %v1177_v56 = vadd.f32 1.5957, %v1161_v44  ;;  %v1285_v0 = vadd.f32 1.0, %v2487_v51 }
 0x21e   : > { %v1133_v29 = vadd.f32 %v1132_v15, %v2447_v33  ;;  %v1212_v22 = vadd.f32 0.5, %v1196_v8  ;;  %1389 = vmatpush.bf16.msra.mxu0 %v1334_v28  ;;  %1949 = vrcp.f32 %v1292_v17  ;;  %v1189_v2 = vmul.f32 %v1173_v43, %v2464_v32 }
 0x21f   : > { %v1197_v16 = vmul.f32 %v1181_v24, %v1150_v12  ;;  %v1293_v30 = vadd.f32 1.0, %v1277_v53  ;;  %v1193_v62 = vmul.f32 %v1177_v56, %v2493_v45  ;;  %v1289_v36 = vadd.f32 1.0, %v1273_v18 }
 0x220   : > { %v1168_v25 = vmul.f32 1.1915, %v1133_v29  ;;  %v1264_v39 = vmul.f32 2.383, %v1133_v29  ;;  %v1151_v41 = vpop.f32.mrf.mxu3  ;;  %v1228_v55 = vmul.f32 %v1212_v22, %v2497_v59  ;;  %v1205_v9 = vadd.f32 0.5, %v1189_v2 }
 0x221   : > { %v1213_v57 = vadd.f32 0.5, %v1197_v16  ;;  %v1152_v42 = vadd.f32 %v1151_v41, %v2447_v33  ;;  %1408 = vmatpush.bf16.msra.mxu1 %v1335_v35  ;;  %1838 = vmatmul.msk.bf16.vlgmr.msra.gmra.mxu0 %vm767_vm0, %v2517_v50  ;;  %1951 = vrcp.f32 %v1293_v30  ;;  %v1220_v10 = vmul.f32 %v1204_v63, %v2449_v40  ;;  %v1853_v40 = vld [vmem:[%s2665_s7 + $0x8] sm:$0xff] }
 0x222   : > { %v1184_v27 = vadd.f32 1.5957, %v1168_v25  ;;  %v1280_v60 = vmul.f32 %v1264_v39, %v1133_v29  ;;  %1953 = vrcp.f32 %v1288_v26  ;;  %v1209_v58 = vadd.f32 0.5, %v1193_v62 }
 0x223   : > { %v1169_v54 = vmul.f32 1.1915, %v1152_v42  ;;  %v1265_v46 = vmul.f32 2.383, %v1152_v42  ;;  %v1229_v20 = vmul.f32 %v1213_v57, %v1150_v12  ;;  %v1244_v12 = vadd.f32 0.0218, %v1228_v55  ;;  %v2548_v57 = vpop.permute.xlu1 %1348 }
 0x224   : > { %v1200_v33 = vmul.f32 %v1184_v27, %v1133_v29  ;;  %v1296_v34 = vadd.f32 1.0, %v1280_v60  ;;  %1840 = vmatmul.msk.bf16.vlgmr.msra.gmra.mxu1 %vm767_vm0, %v2517_v50  ;;  %v1950_v5 = vpop.eup %1949  ;;  %v1240_v8 = vadd.f32 0.0218, %v1224_v14  ;;  %v1221_v31 = vmul.f32 %v1205_v9, %v2464_v32  ;;  %v2551_v27 = vpop.permute.xlu2 %1353 }
 0x225   : > { %v1185_v47 = vadd.f32 1.5957, %v1169_v54  ;;  %v1281_v23 = vmul.f32 %v1265_v46, %v1152_v42  ;;  %v1245_v51 = vadd.f32 0.0218, %v1229_v20  ;;  %v1225_v3 = vmul.f32 %v1209_v58, %v2493_v45 }
 0x226   : > { %v1216_v52 = vadd.f32 0.5, %v1200_v33  ;;  %1955 = vrcp.f32 %v1296_v34  ;;  %v1324_v24 = vmul.f32 %v1950_v5, %v1244_v12  ;;  %v1236_v28 = vadd.f32 0.0218, %v1220_v10 }
 0x227   : > { %v1201_v59 = vmul.f32 %v1185_v47, %v1152_v42  ;;  %v1297_v38 = vadd.f32 1.0, %v1281_v23  ;;  %1957 = vrcp.f32 %v1284_v7  ;;  %v1952_v6 = vpop.eup %1951  ;;  %v1241_v49 = vadd.f32 0.0218, %v1225_v3 }
 0x228   : > { %v1232_v37 = vmul.f32 %v1216_v52, %v1133_v29  ;;  %v1954_v19 = vpop.eup %1953  ;;  %v1325_v21 = vmul.f32 %v1952_v6, %v1245_v51  ;;  %v1237_v18 = vadd.f32 0.0218, %v1221_v31 }
 0x229   : > { %v1217_v4 = vadd.f32 0.5, %v1201_v59  ;;  %1959 = vrcp.f32 %v1297_v38  ;;  %v1320_v29 = vmul.f32 %v1954_v19, %v1240_v8  ;;  %v2556_v59 = vpop.permute.xlu0 %1358 }
 0x22a   : > { %v1248_v48 = vadd.f32 0.0218, %v1232_v37  ;;  %1961 = vrcp.f32 %v1285_v0 }
 0x22b   : > { %v1233_v61 = vmul.f32 %v1217_v4, %v1152_v42  ;;  %1963 = vrcp.f32 %v1289_v36 }
 0x22c   : > { %v1956_v13 = vpop.eup %1955 }
 0x22d   : > { %v1958_v1 = vpop.eup %1957  ;;  %v1328_v53 = vmul.f32 %v1956_v13, %v1248_v48  ;;  %v1249_v15 = vadd.f32 0.0218, %v1233_v61 }
 0x22e   : > { %v1316_v45 = vmul.f32 %v1958_v1, %v1236_v28 }
 0x22f   : > { %v1960_v11 = vpop.eup %1959  ;;  %v1340_v17 = vpack.c.bf16 %v1328_v53, %v1324_v24 }
 0x230   : > { %v1329_v44 = vmul.f32 %v1960_v11, %v1249_v15  ;;  %v1962_v32 = vpop.eup %1961  ;;  %v1336_v30 = vpack.c.bf16 %v1320_v29, %v1316_v45 }
 0x231   : > { %1426 = vmatpush.bf16.msra.mxu2 %v1340_v17  ;;  %v1964_v22 = vpop.eup %1963  ;;  %1839 = vmatmul.msk.bf16.gmra.mxu0 %vm767_vm0, %v1853_v40  ;;  %v1317_v39 = vmul.f32 %v1962_v32, %v1237_v18 }
 0x232   : > { %v1341_v16 = vpack.c.bf16 %v1329_v44, %v1325_v21  ;;  %v1321_v25 = vmul.f32 %v1964_v22, %v1241_v49  ;;  %v2560_v21 = vpop.permute.xlu1 %1363 }
 0x234   : > { %1445 = vmatpush.bf16.msra.mxu3 %v1341_v16  ;;  %1841 = vmatmul.msk.bf16.gmra.mxu1 %vm767_vm0, %v1853_v40  ;;  %v1337_v41 = vpack.c.bf16 %v1321_v25, %v1317_v39 }
 0x235   : > { %1427 = vmatpush.bf16.msra.mxu2 %v1336_v30 }
 0x238   : > { %1446 = vmatpush.bf16.msra.mxu3 %v1337_v41  ;;  %1842 = vmatmul.msk.bf16.vlgmr.msra.gmra.mxu2 %vm767_vm0, %v2517_v50 }
 0x23b   : > { %1844 = vmatmul.msk.bf16.vlgmr.msra.gmra.mxu3 %vm767_vm0, %v2517_v50 }
 0x248   : > { %1843 = vmatmul.msk.bf16.gmra.mxu2 %vm767_vm0, %v1853_v40 }
 0x24b   : > { %1845 = vmatmul.msk.bf16.gmra.mxu3 %vm767_vm0, %v1853_v40 }
 0x29e   : > { %v1391_v35 = vpop.f32.mrf.mxu0 }
 0x29f   : > { %v1392_v42 = vadd.f32 %v1391_v35, %v2548_v57 }
 0x2a1   : > { %v1410_v63 = vpop.f32.mrf.mxu1  ;;  %v1458_v14 = vmul.f32 1.1915, %v1392_v42  ;;  %v1554_v46 = vmul.f32 2.383, %v1392_v42 }
 0x2a2   : > { %v1411_v60 = vadd.f32 %v1410_v63, %v2548_v57 }
 0x2a3   : > { %v1474_v50 = vadd.f32 1.5957, %v1458_v14  ;;  %v1570_v23 = vmul.f32 %v1554_v46, %v1392_v42 }
 0x2a4   : > { %v1459_v34 = vmul.f32 1.1915, %v1411_v60  ;;  %v1555_v56 = vmul.f32 2.383, %v1411_v60 }
 0x2a5   : > { %v1490_v52 = vmul.f32 %v1474_v50, %v1392_v42  ;;  %v1586_v36 = vadd.f32 1.0, %v1570_v23 }
 0x2a6   : > { %v1393_v26 = vpop.f32.mrf.mxu0  ;;  %v1475_v38 = vadd.f32 1.5957, %v1459_v34  ;;  %v1571_v12 = vmul.f32 %v1555_v56, %v1411_v60 }
 0x2a7   : > { %v1394_v54 = vadd.f32 %v1393_v26, %v2551_v27  ;;  %v1506_v4 = vadd.f32 0.5, %v1490_v52  ;;  %1965 = vrcp.f32 %v1586_v36 }
 0x2a8   : > { %v1491_v58 = vmul.f32 %v1475_v38, %v1411_v60  ;;  %v1587_v53 = vadd.f32 1.0, %v1571_v12 }
 0x2a9   : > { %v1462_v55 = vmul.f32 1.1915, %v1394_v54  ;;  %v1558_v7 = vmul.f32 2.383, %v1394_v54  ;;  %v1412_v33 = vpop.f32.mrf.mxu1  ;;  %v1522_v24 = vmul.f32 %v1506_v4, %v1392_v42 }
 0x2aa   : > { %v1413_v43 = vadd.f32 %v1412_v33, %v2551_v27  ;;  %v1507_v15 = vadd.f32 0.5, %v1491_v58 }
 0x2ab   : > { %v1478_v47 = vadd.f32 1.5957, %v1462_v55  ;;  %v1574_v2 = vmul.f32 %v1558_v7, %v1394_v54  ;;  %v1538_v32 = vadd.f32 0.0218, %v1522_v24 }
 0x2ac   : > { %v1463_v20 = vmul.f32 1.1915, %v1413_v43  ;;  %v1559_v5 = vmul.f32 2.383, %v1413_v43  ;;  %v1523_v25 = vmul.f32 %v1507_v15, %v1411_v60 }
 0x2ad   : > { %v1494_v0 = vmul.f32 %v1478_v47, %v1394_v54  ;;  %v1590_v10 = vadd.f32 1.0, %v1574_v2  ;;  %v1966_v30 = vpop.eup %1965 }
 0x2ae   : > { %v1396_v37 = vpop.f32.mrf.mxu0  ;;  %v1479_v62 = vadd.f32 1.5957, %v1463_v20  ;;  %v1575_v61 = vmul.f32 %v1559_v5, %v1413_v43  ;;  %v1618_v33 = vmul.f32 %v1966_v30, %v1538_v32  ;;  %v1539_v34 = vadd.f32 0.0218, %v1523_v25 }
 0x2af   : > { %v1397_v9 = vadd.f32 %v1396_v37, %v2556_v59  ;;  %v1510_v19 = vadd.f32 0.5, %v1494_v0  ;;  %1967 = vrcp.f32 %v1590_v10  ;;  %v2575_v0 = vpop.permute.xlu0 %1645 }
 0x2b0   : > { %v1495_v13 = vmul.f32 %v1479_v62, %v1413_v43  ;;  %v1591_v40 = vadd.f32 1.0, %v1575_v61  ;;  %1969 = vrcp.f32 %v1587_v53  ;;  %v2577_v62 = vpop.permute.xlu2 %1640 }
 0x2b1   : > { %v1466_v6 = vmul.f32 1.1915, %v1397_v9  ;;  %v1415_v48 = vpop.f32.mrf.mxu1  ;;  %v1562_v51 = vmul.f32 2.383, %v1397_v9  ;;  %v1526_v28 = vmul.f32 %v1510_v19, %v1394_v54  ;;  %v1658_v10 = vmul.f32 %v2577_v62, %v1618_v33 }
 0x2b2   : > { %v1416_v8 = vadd.f32 %v1415_v48, %v2556_v59  ;;  %v1511_v29 = vadd.f32 0.5, %v1495_v13  ;;  %1971 = vrcp.f32 %v1591_v40 }
 0x2b3   : > { %v1482_v31 = vadd.f32 1.5957, %v1466_v6  ;;  %v1578_v49 = vmul.f32 %v1562_v51, %v1397_v9  ;;  %v1542_v39 = vadd.f32 0.0218, %v1526_v28 }
 0x2b4   : > { %v1467_v3 = vmul.f32 1.1915, %v1416_v8  ;;  %v1563_v1 = vmul.f32 2.383, %v1416_v8  ;;  %v1527_v63 = vmul.f32 %v1511_v29, %v1413_v43 }
 0x2b5   : > { %v1498_v44 = vmul.f32 %v1482_v31, %v1397_v9  ;;  %v1968_v42 = vpop.eup %1967  ;;  %v1594_v14 = vadd.f32 1.0, %v1578_v49 }
 0x2b6   : > { %v1483_v11 = vadd.f32 1.5957, %v1467_v3  ;;  %v1398_v17 = vpop.f32.mrf.mxu0  ;;  %v1579_v18 = vmul.f32 %v1563_v1, %v1416_v8  ;;  %v1622_v60 = vmul.f32 %v1968_v42, %v1542_v39  ;;  %v1970_v47 = vpop.eup %1969  ;;  %v1543_v23 = vadd.f32 0.0218, %v1527_v63 }
 0x2b7   : > { %v2563_v22 = vadd.f32 %v1398_v17, %v2560_v21  ;;  %v1514_v26 = vadd.f32 0.5, %v1498_v44  ;;  %1973 = vrcp.f32 %v1594_v14  ;;  %v1619_v36 = vmul.f32 %v1970_v47, %v1539_v34 }
 0x2b8   : > { %v1499_v45 = vmul.f32 %v1483_v11, %v1416_v8  ;;  %v1595_v54 = vadd.f32 1.0, %v1579_v18  ;;  %v1972_v43 = vpop.eup %1971  ;;  %v1662_v4 = vmul.f32 %v2575_v0, %v1622_v60 }
 0x2b9   : > { %v1417_v16 = vpop.f32.mrf.mxu1  ;;  %v1470_v7 = vmul.f32 1.1915, %v2563_v22  ;;  %v1530_v56 = vmul.f32 %v1514_v26, %v1397_v9  ;;  %v1566_v2 = vmul.f32 2.383, %v2563_v22  ;;  %v1623_v6 = vmul.f32 %v1972_v43, %v1543_v23 }
 0x2ba   : > { %v2566_v35 = vadd.f32 %v1417_v16, %v2560_v21  ;;  %v1515_v50 = vadd.f32 0.5, %v1499_v45  ;;  %1975 = vrcp.f32 %v1595_v54  ;;  %v1659_v15 = vmul.f32 %v2577_v62, %v1619_v36 }
 0x2bb   : > { %v1429_v41 = vpop.f32.mrf.mxu2  ;;  %v1486_v37 = vadd.f32 1.5957, %v1470_v7  ;;  %v1546_v58 = vadd.f32 0.0218, %v1530_v56  ;;  %v1582_v61 = vmul.f32 %v1566_v2, %v2563_v22  ;;  %v2594_v28 = vadd.f32 %v1662_v4, %v1658_v10 }
 0x2bc   : > { %v1471_v46 = vmul.f32 1.1915, %v2566_v35  ;;  %v2571_v20 = vadd.f32 %v1429_v41, %v2548_v57  ;;  %v1567_v38 = vmul.f32 2.383, %v2566_v35  ;;  %v1531_v5 = vmul.f32 %v1515_v50, %v1416_v8 }
 0x2bd   : > { %v1974_v13 = vpop.eup %1973  ;;  %v1502_v3 = vmul.f32 %v1486_v37, %v2563_v22  ;;  %v1663_v40 = vmul.f32 %v2575_v0, %v1623_v6  ;;  %v1598_v18 = vadd.f32 1.0, %v1582_v61 }
 0x2be   : > { %v1448_v55 = vpop.f32.mrf.mxu3  ;;  %v1487_v52 = vadd.f32 1.5957, %v1471_v46  ;;  %v1460_v9 = vmul.f32 1.1915, %v2571_v20  ;;  %v1583_v8 = vmul.f32 %v1567_v38, %v2566_v35  ;;  %v1547_v51 = vadd.f32 0.0218, %v1531_v5  ;;  %v2612_v46 = vpop.permute.xlu1 %1650 }
 0x2bf   : > { %v2584_v19 = vadd.f32 %v1448_v55, %v2548_v57  ;;  %v1556_v31 = vmul.f32 2.383, %v2571_v20  ;;  %v1626_v45 = vmul.f32 %v1974_v13, %v1546_v58  ;;  %v1518_v25 = vadd.f32 0.5, %v1502_v3 }
 0x2c0   : > { %v1503_v48 = vmul.f32 %v1487_v52, %v2566_v35  ;;  %v1976_v53 = vpop.eup %1975  ;;  %v1599_v57 = vadd.f32 1.0, %v1583_v8  ;;  %v1476_v11 = vadd.f32 1.5957, %v1460_v9  ;;  %v1683_v50 = vadd.f32 %v1663_v40, %v1659_v15 }
 0x2c1   : > { %v1461_v49 = vmul.f32 1.1915, %v2584_v19  ;;  %v1557_v44 = vmul.f32 2.383, %v2584_v19  ;;  %v1627_v16 = vmul.f32 %v1976_v53, %v1547_v51  ;;  %v1572_v30 = vmul.f32 %v1556_v31, %v2571_v20 }
 0x2c2   : > { %v1519_v17 = vadd.f32 0.5, %v1503_v48  ;;  %1977 = vrcp.f32 %v1599_v57  ;;  %v1492_v14 = vmul.f32 %v1476_v11, %v2571_v20  ;;  %v1534_v60 = vmul.f32 %v1518_v25, %v2563_v22 }
 0x2c3   : > { %v1431_v12 = vpop.f32.mrf.mxu2  ;;  %v1477_v55 = vadd.f32 1.5957, %v1461_v49  ;;  %v1573_v7 = vmul.f32 %v1557_v44, %v2584_v19  ;;  %1979 = vrcp.f32 %v1598_v18  ;;  %v1667_v33 = vmul.f32 %v2612_v46, %v1627_v16  ;;  %v2631_v18 = vpop.permute.xlu2 %1655 }
 0x2c4   : > { %v2591_v1 = vadd.f32 %v1431_v12, %v2551_v27  ;;  %v1535_v26 = vmul.f32 %v1519_v17, %v2566_v35  ;;  %v1588_v34 = vadd.f32 1.0, %v1572_v30  ;;  %v2622_v2 = vmul.f32 %v2612_v46, %v1626_v45 }
 0x2c5   : > { %v1508_v38 = vadd.f32 0.5, %v1492_v14  ;;  %v1493_v22 = vmul.f32 %v1477_v55, %v2584_v19  ;;  %v1589_v4 = vadd.f32 1.0, %v1573_v7  ;;  %v1550_v6 = vadd.f32 0.0218, %v1534_v60 }
 0x2c6   : > { %v1450_v24 = vpop.f32.mrf.mxu3  ;;  %v1464_v29 = vmul.f32 1.1915, %v2591_v1  ;;  %v1560_v41 = vmul.f32 2.383, %v2591_v1  ;;  %v1551_v5 = vadd.f32 0.0218, %v1535_v26  ;;  %1981 = vrcp.f32 %v1588_v34 }
 0x2c7   : > { %v2601_v32 = vadd.f32 %v1450_v24, %v2551_v27  ;;  %v1684_v61 = vadd.f32 %v1683_v50, %v1667_v33  ;;  %v1524_v57 = vmul.f32 %v1508_v38, %v2571_v20  ;;  %v1509_v40 = vadd.f32 0.5, %v1493_v22 }
 0x2c8   : > { %v1480_v39 = vadd.f32 1.5957, %v1464_v29  ;;  %v1576_v52 = vmul.f32 %v1560_v41, %v2591_v1  ;;  %v1978_v36 = vpop.eup %1977  ;;  %1983 = vrcp.f32 %v1589_v4 }
 0x2c9   : > { %v1465_v42 = vmul.f32 1.1915, %v2601_v32  ;;  %v1561_v54 = vmul.f32 2.383, %v2601_v32  ;;  %v1980_v58 = vpop.eup %1979  ;;  %v1631_v31 = vmul.f32 %v1978_v36, %v1551_v5  ;;  %v1525_v26 = vmul.f32 %v1509_v40, %v2584_v19 }
 0x2ca   : > { %v1496_v35 = vmul.f32 %v1480_v39, %v2591_v1  ;;  %v1592_v13 = vadd.f32 1.0, %v1576_v52  ;;  %v1630_v45 = vmul.f32 %v1980_v58, %v1550_v6 }
 0x2cb   : > { %v1434_v63 = vpop.f32.mrf.mxu2  ;;  %v1481_v47 = vadd.f32 1.5957, %v1465_v42  ;;  %v1577_v37 = vmul.f32 %v1561_v54, %v2601_v32  ;;  %v1671_v39 = vmul.f32 %v2631_v18, %v1631_v31  ;;  %v1540_v42 = vadd.f32 0.0218, %v1524_v57 }
 0x2cc   : > { %v2610_v27 = vadd.f32 %v1434_v63, %v2556_v59  ;;  %v1512_v8 = vadd.f32 0.5, %v1496_v35  ;;  %1985 = vrcp.f32 %v1592_v13  ;;  %v1982_v25 = vpop.eup %1981 }
 0x2cd   : > { %v1497_v9 = vmul.f32 %v1481_v47, %v2601_v32  ;;  %v1593_v3 = vadd.f32 1.0, %v1577_v37  ;;  %v1685_v60 = vadd.f32 %v1684_v61, %v1671_v39  ;;  %v1620_v31 = vmul.f32 %v1982_v25, %v1540_v42 }
 0x2ce   : > { %v1453_v23 = vpop.f32.mrf.mxu3  ;;  %v1468_v43 = vmul.f32 1.1915, %v2610_v27  ;;  %v1564_v56 = vmul.f32 2.383, %v2610_v27  ;;  %v1528_v20 = vmul.f32 %v1512_v8, %v2591_v1  ;;  %v1984_v7 = vpop.eup %1983  ;;  %v1670_v1 = vmul.f32 %v2631_v18, %v1630_v45 }
 0x2cf   : > { %v1454_v48 = vadd.f32 %v1453_v23, %v2556_v59  ;;  %v1513_v17 = vadd.f32 0.5, %v1497_v9  ;;  %1987 = vrcp.f32 %v1593_v3  ;;  %v1686_v9 = vrot.slane %v1685_v60, 4 }
 0x2d0   : > { %v1484_v12 = vadd.f32 1.5957, %v1468_v43  ;;  %v1580_v10 = vmul.f32 %v1564_v56, %v2610_v27  ;;  %v1544_v47 = vadd.f32 0.0218, %v1528_v20 }
 0x2d1   : > { %v1469_v24 = vmul.f32 1.1915, %v1454_v48  ;;  %v1565_v53 = vmul.f32 2.383, %v1454_v48  ;;  %v1529_v54 = vmul.f32 %v1513_v17, %v2601_v32  ;;  %v1675_v32 = vadd.f32 %v2594_v28, %v2622_v2 }
 0x2d2   : > { %v1500_v51 = vmul.f32 %v1484_v12, %v2610_v27  ;;  %v1596_v11 = vadd.f32 1.0, %v1580_v10  ;;  %v1986_v35 = vpop.eup %1985  ;;  %v1660_v17 = vmul.f32 %v2577_v62, %v1620_v31 }
 0x2d3   : > { %v1436_v15 = vpop.f32.mrf.mxu2  ;;  %v1485_v49 = vadd.f32 1.5957, %v1469_v24  ;;  %v1581_v59 = vmul.f32 %v1565_v53, %v1454_v48  ;;  %v1545_v5 = vadd.f32 0.0218, %v1529_v54  ;;  %v1676_v6 = vadd.f32 %v1675_v32, %v1670_v1 }
 0x2d4   : > { %v1516_v29 = vadd.f32 0.5, %v1500_v51  ;;  %v1437_v16 = vadd.f32 %v1436_v15, %v2560_v21  ;;  %1989 = vrcp.f32 %v1596_v11  ;;  %v1687_v53 = vadd.f32 %v1686_v9, %v1685_v60 }
 0x2d5   : > { %v1501_v41 = vmul.f32 %v1485_v49, %v1454_v48  ;;  %v1597_v63 = vadd.f32 1.0, %v1581_v59  ;;  %v1988_v38 = vpop.eup %1987  ;;  %v1677_v11 = vrot.slane %v1676_v6, 4 }
 0x2d6   : > { %v1455_v44 = vpop.f32.mrf.mxu3  ;;  %v1472_v14 = vmul.f32 1.1915, %v1437_v16  ;;  %v1532_v50 = vmul.f32 %v1516_v29, %v2610_v27  ;;  %v1568_v33 = vmul.f32 2.383, %v1437_v16  ;;  %v1541_v27 = vadd.f32 0.0218, %v1525_v26 }
 0x2d7   : > { %v1456_v30 = vadd.f32 %v1455_v44, %v2560_v21  ;;  %v1517_v55 = vadd.f32 0.5, %v1501_v41  ;;  %1991 = vrcp.f32 %v1597_v63  ;;  %v1625_v3 = vmul.f32 %v1988_v38, %v1545_v5 }
 0x2d8   : > { %v1488_v21 = vadd.f32 1.5957, %v1472_v14  ;;  %v1584_v43 = vmul.f32 %v1568_v33, %v1437_v16  ;;  %v1548_v37 = vadd.f32 0.0218, %v1532_v50  ;;  %v1621_v2 = vmul.f32 %v1984_v7, %v1541_v27 }
 0x2d9   : > { %v1473_v34 = vmul.f32 1.1915, %v1456_v30  ;;  %v1533_v23 = vmul.f32 %v1517_v55, %v1454_v48  ;;  %v1569_v19 = vmul.f32 2.383, %v1456_v30  ;;  %v1624_v48 = vmul.f32 %v1986_v35, %v1544_v47 }
 0x2da   : > { %v1504_v52 = vmul.f32 %v1488_v21, %v1437_v16  ;;  %v1990_v36 = vpop.eup %1989  ;;  %v1600_v4 = vadd.f32 1.0, %v1584_v43  ;;  %v1665_v29 = vmul.f32 %v2575_v0, %v1625_v3  ;;  %v1661_v45 = vmul.f32 %v2577_v62, %v1621_v2 }
 0x2db   : > { %v1489_v56 = vadd.f32 1.5957, %v1473_v34  ;;  %v1585_v10 = vmul.f32 %v1569_v19, %v1456_v30  ;;  %v1549_v58 = vadd.f32 0.0218, %v1533_v23  ;;  %v1628_v28 = vmul.f32 %v1990_v36, %v1548_v37  ;;  %v1714_v23 = vpop.permute.xlu0 %1713 }
 0x2dc   : > { %v1520_v22 = vadd.f32 0.5, %v1504_v52  ;;  %1993 = vrcp.f32 %v1600_v4  ;;  %v1664_v15 = vmul.f32 %v2575_v0, %v1624_v48  ;;  %v1678_v41 = vadd.f32 %v1677_v11, %v1676_v6 }
 0x2dd   : > { %v1505_v12 = vmul.f32 %v1489_v56, %v1456_v30  ;;  %v1992_v61 = vpop.eup %1991  ;;  %v1601_v51 = vadd.f32 1.0, %v1585_v10  ;;  %v1668_v49 = vmul.f32 %v2612_v46, %v1628_v28  ;;  %v1701_v42 = vadd.f32 %v1665_v29, %v1661_v45 }
 0x2de   : > { %v1536_v8 = vmul.f32 %v1520_v22, %v1437_v16  ;;  %v1629_v57 = vmul.f32 %v1992_v61, %v1549_v58  ;;  %v1688_v16 = vrot.slane %v1687_v53, 2  ;;  %v1692_v25 = vadd.f32 %v1664_v15, %v1660_v17 }
 0x2df   : > { %v1521_v13 = vadd.f32 0.5, %v1505_v12  ;;  %1995 = vrcp.f32 %v1601_v51  ;;  %v1679_v7 = vrot.slane %v1678_v41, 2  ;;  %v1716_v56 = vperm.slane %v1714_v23, 0 }
 0x2e0   : > { %v1552_v40 = vadd.f32 0.0218, %v1536_v8  ;;  %v1693_v63 = vadd.f32 %v1692_v25, %v1668_v49  ;;  %v1689_v54 = vadd.f32 %v1688_v16, %v1687_v53  ;;  %v1735_v4 = vlaneseq }
 0x2e1   : > { %v1537_v24 = vmul.f32 %v1521_v13, %v1456_v30  ;;  %v1669_v30 = vmul.f32 %v2612_v46, %v1629_v57  ;;  %v1680_v46 = vadd.f32 %v1679_v7, %v1678_v41 }
 0x2e2   : > { %v1994_v44 = vpop.eup %1993  ;;  %v1690_v33 = vrot.slane %v1689_v54, 1  ;;  %vm1737_vm4 = vcmp.lt.s32.totalorder %v1735_v4, 512 }
 0x2e3   : > { %v1553_v59 = vadd.f32 0.0218, %v1537_v24  ;;  %v1632_v39 = vmul.f32 %v1994_v44, %v1552_v40  ;;  %v1702_v0 = vadd.f32 %v1701_v42, %v1669_v30  ;;  %v1681_v19 = vrot.slane %v1680_v46, 1 }
 0x2e4   : > { %v1691_v35 = vadd.f32 %v1690_v33, %v1689_v54 }
 0x2e5   : > { %v1996_v20 = vpop.eup %1995  ;;  %v1672_v14 = vmul.f32 %v2631_v18, %v1632_v39  ;;  %v1682_v37 = vadd.f32 %v1681_v19, %v1680_v46 }
 0x2e6   : > { %v1633_v26 = vmul.f32 %v1996_v20, %v1553_v59  ;;  %v1718_v27 = vadd.f32 %v1716_v56, %v1691_v35 }
 0x2e7   : > { %v1694_v50 = vadd.f32 %v1693_v63, %v1672_v14  ;;  %v1717_v9 = vadd.f32 %v1716_v56, %v1682_v37 }
 0x2e8   : > { %v1673_v55 = vmul.f32 %v2631_v18, %v1633_v26  ;;  %v1725_v12 = vrot.slane %v1718_v27, 7 }
 0x2e9   : > { %v1695_v21 = vrot.slane %v1694_v50, 4 }
 0x2ea   : > { %v1703_v62 = vadd.f32 %v1702_v0, %v1673_v55  ;;  %v1729_v58 = vsel %vm1728_vm1, %v1717_v9, %v1725_v12 }
 0x2eb   : > { %v1696_v34 = vadd.f32 %v1695_v21, %v1694_v50 }
 0x2ec   : > { %v1704_v1 = vrot.slane %v1703_v62, 4 }
 0x2ed   : > { %v1697_v60 = vrot.slane %v1696_v34, 2 }
 0x2ee   : > { %v1705_v47 = vadd.f32 %v1704_v1, %v1703_v62 }
 0x2ef   : > { %v1698_v52 = vadd.f32 %v1697_v60, %v1696_v34 }
 0x2f0   : > { %v1706_v43 = vrot.slane %v1705_v47, 2 }
 0x2f1   : > { %v1699_v38 = vrot.slane %v1698_v52, 1 }
 0x2f2   : > { %v1707_v32 = vadd.f32 %v1706_v43, %v1705_v47 }
 0x2f3   : > { %v1700_v18 = vadd.f32 %v1699_v38, %v1698_v52 }
 0x2f4   : > { %v1708_v5 = vrot.slane %v1707_v32, 1 }
 0x2f5   : > { %v1719_v36 = vadd.f32 %v1716_v56, %v1700_v18 }
 0x2f6   : > { %v1709_v22 = vadd.f32 %v1708_v5, %v1707_v32 }
 0x2f7   : > { %v1726_v10 = vrot.slane %v1719_v36, 6 }
 0x2f8   : > { %v1720_v6 = vadd.f32 %v1716_v56, %v1709_v22 }
 0x2fa   : > { %v1727_v48 = vrot.slane %v1720_v6, 5 }
 0x2fc   : > { %v1731_v61 = vsel %vm1730_vm2, %v1726_v10, %v1727_v48 }
 0x2fd   : > { %v1733_v8 = vsel %vm1732_vm3, %v1729_v58, %v1731_v61 }
 0x2fe   : > { %1739 = vst.msk [vmem:[%s388_s14] sm:$0xf] %vm1737_vm4, %v1733_v8 }
 0x2ff PF: > { %s23_s19 = sadd.s32 1, %s2003_s19  }
 0x300   : > { %p20_p4 = scmp.ge.s32.totalorder %s23_s19, 4  }
 0x302   :  { %22 = sbr.rel (!%p20_p4) target bundleno = 3 (0x3), region = 94 }

</bundles_post_ra>
